<compile_context>
chip_gen: v5e
topology: v5e:2x2
jax: 0.10.0
libtpu: 0.0.40
codegen_flags: <defaults>
</compile_context>

<pallas_src>
import jax
import jax.numpy as jnp
from jax.experimental import pallas as pl
from jax.experimental.pallas import tpu as pltpu

LANE = 128       # pad hidden feature dims to the vreg lane width (lane-dense middle layers)
ROW_ALIGN = 16   # bf16 packs 16 rows per sublane group
MIN_TILES = 4    # keep several grid steps so v7x's 2nd TC + DMA pipeline stay busy


def _round_up(n, m):
    return ((n + m - 1) // m) * m


def sae_kernel(x_ref,
               w1_ref, b1_ref,
               w2_ref, b2_ref,
               w3_ref, b3_ref,
               w4_ref, b4_ref,
               out_ref):
    """One batch tile of the 4-layer SAE (Linear + sigmoid each, eval-mode dropout)."""

    def layer(h, w_ref, b_ref):
        # bf16 MXU matmul with f32 accumulation, then f32 bias + sigmoid.
        acc = jnp.dot(h, w_ref[...], preferred_element_type=jnp.float32) + b_ref[...]
        return jax.nn.sigmoid(acc)

    # Unpadded x tile ([TB, d_in] f32), cast to bf16 in-register. Keeping the
    # logical block at the true d_in lets Mosaic mask the lane padding in the
    # K-reduction (no stale-lane leakage).
    h = x_ref[...].astype(jnp.bfloat16)
    h = layer(h, w1_ref, b1_ref).astype(jnp.bfloat16)   # encoder1
    h = layer(h, w2_ref, b2_ref).astype(jnp.bfloat16)   # encoder2
    # TODO(synk): Dropout(0.3) is the identity here (eval-mode semantics);
    # training-mode stochastic dropout would need pltpu.prng_seed/prng_random_bits.
    h = layer(h, w3_ref, b3_ref).astype(jnp.bfloat16)   # encoder3
    out_ref[...] = layer(h, w4_ref, b4_ref)             # encoder4 -> f32, true d_out width


def pad_params(params):
    """One-time prep, hoisted out of the forward hot path.

    Weights -> bf16, stored [D_in, D_out]. Hidden feature dims are zero-padded
    to the 128-lane width (lane-dense MXU tiles through the middle layers); the
    first layer keeps its true input rows and the last its true output columns
    so the kernel only streams real input/output bytes. Zero-padded weight rows
    cancel the sigmoid(0)=0.5 values that appear in padded hidden columns.
    """
    n = len(params)
    padded = []
    for li, (w, b) in enumerate(params):
        di, do = w.shape
        di_p = di if li == 0 else _round_up(di, LANE)
        do_p = do if li == n - 1 else _round_up(do, LANE)
        w_p = (jnp.zeros((di_p, do_p), jnp.float32)
               .at[:di, :do].set(w)
               .astype(jnp.bfloat16))
        b_p = jnp.zeros((1, do_p), jnp.float32).at[:, :do].set(b)
        padded.append((w_p, b_p))
    return padded


def sae_forward(x, padded_params, *, tile_b=1024):
    """x: [B, d_in] f32 (unpadded); padded_params: output of pad_params()."""
    B, d_in = x.shape
    d_out = padded_params[-1][0].shape[1]

    # Batch tile: as large as possible (amortize ~0.35us/step overhead), but
    # keep >= MIN_TILES grid steps for small batches (v7x megacore + pipelining).
    if B >= MIN_TILES * tile_b:
        TB = tile_b
    else:
        TB = min(tile_b, max(ROW_ALIGN, _round_up(-(-B // MIN_TILES), ROW_ALIGN)))
    B_p = _round_up(B, TB)

    # Row-only padding (no lane padding); skipped entirely when B divides evenly.
    x_p = x if B_p == B else jnp.zeros((B_p, d_in), x.dtype).at[:B].set(x)

    grid = (B_p // TB,)

    def tile_spec(shape):
        # batch-tiled arrays: block index advances along the batch axis
        return pl.BlockSpec(shape, lambda i: (i, 0))

    def resident_spec(shape):
        # weights/biases: same block every grid step -> DMA'd once, VMEM-resident
        return pl.BlockSpec(shape, lambda i: (0, 0))

    in_specs = [tile_spec((TB, d_in))]
    flat_args = [x_p]
    for (w_p, b_p) in padded_params:
        in_specs += [resident_spec(w_p.shape), resident_spec(b_p.shape)]
        flat_args += [w_p, b_p]

    out_p = pl.pallas_call(
        sae_kernel,
        out_shape=jax.ShapeDtypeStruct((B_p, d_out), jnp.float32),
        grid=grid,
        in_specs=in_specs,
        out_specs=tile_spec((TB, d_out)),
        compiler_params=pltpu.CompilerParams(
            dimension_semantics=("parallel",)),   # shard batch tiles across v7x TCs
    )(*flat_args)

    # Only padded batch rows (from zero inputs) need slicing away.
    return out_p if B_p == B else out_p[:B]


def init_params(key, dims):
    """Deterministic init for 4 Linear layers. dims = [d_in, d1, d2, d3, d4]."""
    params = []
    for i in range(4):
        key, kw, kb = jax.random.split(key, 3)
        d_in, d_out = dims[i], dims[i + 1]
        bound = 1.0 / jnp.sqrt(d_in)  # matches torch.nn.Linear default init range
        w = jax.random.uniform(kw, (d_in, d_out), jnp.float32, -bound, bound)
        b = jax.random.uniform(kb, (1, d_out), jnp.float32, -bound, bound)
        params.append((w, b))
    return params


def sae_reference(x, params):
    """Plain-JAX f32 reference for correctness check."""
    h = x
    for (w, b) in params:
        h = jax.nn.sigmoid(h @ w + b)
    return h


if __name__ == "__main__":
    key = jax.random.PRNGKey(0)
    key, kx = jax.random.split(key)

    # small SAE: 32 -> 24 -> 16 -> 12 -> 8
    dims = [32, 24, 16, 12, 8]
    B = 300   # not a multiple of the batch tile -> exercises the pad/slice path

    x = jax.random.normal(kx, (B, dims[0]), jnp.float32)
    params = init_params(key, dims)

    # Padding / bf16 cast done once, outside the hot forward path.
    padded_params = pad_params(params)
    fwd = jax.jit(sae_forward)

    out = jax.block_until_ready(fwd(x, padded_params))
    ref = sae_reference(x, params)

    assert out.shape == (B, dims[-1]), out.shape
    # kernel uses bf16 weights/activations vs. the f32 reference -> loose tol
    max_err = float(jnp.max(jnp.abs(out - ref)))
    assert jnp.allclose(out, ref, atol=3e-2), f"mismatch vs reference: {max_err}"

    print("KERNEL_OK")
</pallas_src>

<mosaic_0001>
module attributes {stable_mosaic.version = 11 : i64} {
  func.func @sae_kernel(%arg0: i32, %arg1: memref<80x32xf32, #tpu.memory_space<vmem>>, %arg2: memref<32x128xbf16, #tpu.memory_space<vmem>>, %arg3: memref<1x128xf32, #tpu.memory_space<vmem>>, %arg4: memref<128x128xbf16, #tpu.memory_space<vmem>>, %arg5: memref<1x128xf32, #tpu.memory_space<vmem>>, %arg6: memref<128x128xbf16, #tpu.memory_space<vmem>>, %arg7: memref<1x128xf32, #tpu.memory_space<vmem>>, %arg8: memref<128x8xbf16, #tpu.memory_space<vmem>>, %arg9: memref<1x8xf32, #tpu.memory_space<vmem>>, %arg10: memref<80x8xf32, #tpu.memory_space<vmem>>) attributes {dimension_semantics = [#tpu.dimension_semantics<parallel>], iteration_bounds = array<i64: 4>, scalar_prefetch = 0 : i64, scratch_operands = 0 : i64, tpu.core_type = #tpu.core_type<tc>, window_params = [{transform_indices = @transform_0, window_bounds = array<i64: 80, 32>}, {pipeline_mode = #tpu.pipeline_mode<synchronous>, transform_indices = @transform_1, window_bounds = array<i64: 32, 128>}, {pipeline_mode = #tpu.pipeline_mode<synchronous>, transform_indices = @transform_2, window_bounds = array<i64: 1, 128>}, {pipeline_mode = #tpu.pipeline_mode<synchronous>, transform_indices = @transform_3, window_bounds = array<i64: 128, 128>}, {pipeline_mode = #tpu.pipeline_mode<synchronous>, transform_indices = @transform_4, window_bounds = array<i64: 1, 128>}, {pipeline_mode = #tpu.pipeline_mode<synchronous>, transform_indices = @transform_5, window_bounds = array<i64: 128, 128>}, {pipeline_mode = #tpu.pipeline_mode<synchronous>, transform_indices = @transform_6, window_bounds = array<i64: 1, 128>}, {pipeline_mode = #tpu.pipeline_mode<synchronous>, transform_indices = @transform_7, window_bounds = array<i64: 128, 8>}, {pipeline_mode = #tpu.pipeline_mode<synchronous>, transform_indices = @transform_8, window_bounds = array<i64: 1, 8>}, {transform_indices = @transform_9, window_bounds = array<i64: 80, 8>}]} {
    %c0 = arith.constant 0 : index
    %c0_0 = arith.constant 0 : index
    %0 = vector.load %arg1[%c0, %c0_0] : memref<80x32xf32, #tpu.memory_space<vmem>>, vector<80x32xf32>
    %1 = arith.truncf %0 : vector<80x32xf32> to vector<80x32xbf16>
    %c0_1 = arith.constant 0 : index
    %c0_2 = arith.constant 0 : index
    %2 = vector.load %arg2[%c0_1, %c0_2] : memref<32x128xbf16, #tpu.memory_space<vmem>>, vector<32x128xbf16>
    %cst = arith.constant dense<0.000000e+00> : vector<80x128xf32>
    %3 = tpu.matmul %1, %2, %cst {dimension_numbers = #tpu.dot_dimension_numbers<[1], [0], [0], [1], [0, 0, 1, 1], [], []>} : vector<80x32xbf16>, vector<32x128xbf16>, vector<80x128xf32> -> vector<80x128xf32>
    %c0_3 = arith.constant 0 : index
    %c0_4 = arith.constant 0 : index
    %4 = vector.load %arg3[%c0_3, %c0_4] : memref<1x128xf32, #tpu.memory_space<vmem>>, vector<1x128xf32>
    %5 = vector.broadcast %4 : vector<1x128xf32> to vector<80x128xf32>
    %6 = arith.addf %3, %5 : vector<80x128xf32>
    %7 = arith.negf %6 : vector<80x128xf32>
    %8 = math.exp %7 : vector<80x128xf32>
    %cst_5 = arith.constant 1.000000e+00 : f32
    %9 = vector.broadcast %cst_5 : f32 to vector<80x128xf32>
    %10 = arith.addf %9, %8 : vector<80x128xf32>
    %11 = arith.divf %9, %10 : vector<80x128xf32>
    %12 = arith.truncf %11 : vector<80x128xf32> to vector<80x128xbf16>
    %c0_6 = arith.constant 0 : index
    %c0_7 = arith.constant 0 : index
    %13 = vector.load %arg4[%c0_6, %c0_7] : memref<128x128xbf16, #tpu.memory_space<vmem>>, vector<128x128xbf16>
    %cst_8 = arith.constant dense<0.000000e+00> : vector<80x128xf32>
    %14 = tpu.matmul %12, %13, %cst_8 {dimension_numbers = #tpu.dot_dimension_numbers<[1], [0], [0], [1], [0, 0, 1, 1], [], []>} : vector<80x128xbf16>, vector<128x128xbf16>, vector<80x128xf32> -> vector<80x128xf32>
    %c0_9 = arith.constant 0 : index
    %c0_10 = arith.constant 0 : index
    %15 = vector.load %arg5[%c0_9, %c0_10] : memref<1x128xf32, #tpu.memory_space<vmem>>, vector<1x128xf32>
    %16 = vector.broadcast %15 : vector<1x128xf32> to vector<80x128xf32>
    %17 = arith.addf %14, %16 : vector<80x128xf32>
    %18 = arith.negf %17 : vector<80x128xf32>
    %19 = math.exp %18 : vector<80x128xf32>
    %cst_11 = arith.constant 1.000000e+00 : f32
    %20 = vector.broadcast %cst_11 : f32 to vector<80x128xf32>
    %21 = arith.addf %20, %19 : vector<80x128xf32>
    %22 = arith.divf %20, %21 : vector<80x128xf32>
    %23 = arith.truncf %22 : vector<80x128xf32> to vector<80x128xbf16>
    %c0_12 = arith.constant 0 : index
    %c0_13 = arith.constant 0 : index
    %24 = vector.load %arg6[%c0_12, %c0_13] : memref<128x128xbf16, #tpu.memory_space<vmem>>, vector<128x128xbf16>
    %cst_14 = arith.constant dense<0.000000e+00> : vector<80x128xf32>
    %25 = tpu.matmul %23, %24, %cst_14 {dimension_numbers = #tpu.dot_dimension_numbers<[1], [0], [0], [1], [0, 0, 1, 1], [], []>} : vector<80x128xbf16>, vector<128x128xbf16>, vector<80x128xf32> -> vector<80x128xf32>
    %c0_15 = arith.constant 0 : index
    %c0_16 = arith.constant 0 : index
    %26 = vector.load %arg7[%c0_15, %c0_16] : memref<1x128xf32, #tpu.memory_space<vmem>>, vector<1x128xf32>
    %27 = vector.broadcast %26 : vector<1x128xf32> to vector<80x128xf32>
    %28 = arith.addf %25, %27 : vector<80x128xf32>
    %29 = arith.negf %28 : vector<80x128xf32>
    %30 = math.exp %29 : vector<80x128xf32>
    %cst_17 = arith.constant 1.000000e+00 : f32
    %31 = vector.broadcast %cst_17 : f32 to vector<80x128xf32>
    %32 = arith.addf %31, %30 : vector<80x128xf32>
    %33 = arith.divf %31, %32 : vector<80x128xf32>
    %34 = arith.truncf %33 : vector<80x128xf32> to vector<80x128xbf16>
    %c0_18 = arith.constant 0 : index
    %c0_19 = arith.constant 0 : index
    %35 = vector.load %arg8[%c0_18, %c0_19] : memref<128x8xbf16, #tpu.memory_space<vmem>>, vector<128x8xbf16>
    %cst_20 = arith.constant dense<0.000000e+00> : vector<80x8xf32>
    %36 = tpu.matmul %34, %35, %cst_20 {dimension_numbers = #tpu.dot_dimension_numbers<[1], [0], [0], [1], [0, 0, 1, 1], [], []>} : vector<80x128xbf16>, vector<128x8xbf16>, vector<80x8xf32> -> vector<80x8xf32>
    %c0_21 = arith.constant 0 : index
    %c0_22 = arith.constant 0 : index
    %37 = vector.load %arg9[%c0_21, %c0_22] : memref<1x8xf32, #tpu.memory_space<vmem>>, vector<1x8xf32>
    %38 = vector.broadcast %37 : vector<1x8xf32> to vector<80x8xf32>
    %39 = arith.addf %36, %38 : vector<80x8xf32>
    %40 = arith.negf %39 : vector<80x8xf32>
    %41 = math.exp %40 : vector<80x8xf32>
    %cst_23 = arith.constant 1.000000e+00 : f32
    %42 = vector.broadcast %cst_23 : f32 to vector<80x8xf32>
    %43 = arith.addf %42, %41 : vector<80x8xf32>
    %44 = arith.divf %42, %43 : vector<80x8xf32>
    %c0_24 = arith.constant 0 : index
    %c0_25 = arith.constant 0 : index
    %45 = vector.load %arg10[%c0_24, %c0_25] : memref<80x8xf32, #tpu.memory_space<vmem>>, vector<80x8xf32>
    tpu.vector_store %arg10[%c0_24, %c0_25], %44 {strides = array<i32>} : memref<80x8xf32, #tpu.memory_space<vmem>>, vector<80x8xf32>,
    return
  }
  func.func @transform_0(%arg0: i32) -> (i32, i32) {
    %c0_i32 = arith.constant 0 : i32
    %c0_i32_0 = arith.constant 0 : i32
    return %arg0, %c0_i32 : i32, i32
  }
  func.func @transform_1(%arg0: i32) -> (i32, i32) {
    %c0_i32 = arith.constant 0 : i32
    %c0_i32_0 = arith.constant 0 : i32
    %c0_i32_1 = arith.constant 0 : i32
    return %c0_i32, %c0_i32_0 : i32, i32
  }
  func.func @transform_2(%arg0: i32) -> (i32, i32) {
    %c0_i32 = arith.constant 0 : i32
    %c0_i32_0 = arith.constant 0 : i32
    %c0_i32_1 = arith.constant 0 : i32
    return %c0_i32, %c0_i32_0 : i32, i32
  }
  func.func @transform_3(%arg0: i32) -> (i32, i32) {
    %c0_i32 = arith.constant 0 : i32
    %c0_i32_0 = arith.constant 0 : i32
    %c0_i32_1 = arith.constant 0 : i32
    return %c0_i32, %c0_i32_0 : i32, i32
  }
  func.func @transform_4(%arg0: i32) -> (i32, i32) {
    %c0_i32 = arith.constant 0 : i32
    %c0_i32_0 = arith.constant 0 : i32
    %c0_i32_1 = arith.constant 0 : i32
    return %c0_i32, %c0_i32_0 : i32, i32
  }
  func.func @transform_5(%arg0: i32) -> (i32, i32) {
    %c0_i32 = arith.constant 0 : i32
    %c0_i32_0 = arith.constant 0 : i32
    %c0_i32_1 = arith.constant 0 : i32
    return %c0_i32, %c0_i32_0 : i32, i32
  }
  func.func @transform_6(%arg0: i32) -> (i32, i32) {
    %c0_i32 = arith.constant 0 : i32
    %c0_i32_0 = arith.constant 0 : i32
    %c0_i32_1 = arith.constant 0 : i32
    return %c0_i32, %c0_i32_0 : i32, i32
  }
  func.func @transform_7(%arg0: i32) -> (i32, i32) {
    %c0_i32 = arith.constant 0 : i32
    %c0_i32_0 = arith.constant 0 : i32
    %c0_i32_1 = arith.constant 0 : i32
    return %c0_i32, %c0_i32_0 : i32, i32
  }
  func.func @transform_8(%arg0: i32) -> (i32, i32) {
    %c0_i32 = arith.constant 0 : i32
    %c0_i32_0 = arith.constant 0 : i32
    %c0_i32_1 = arith.constant 0 : i32
    return %c0_i32, %c0_i32_0 : i32, i32
  }
  func.func @transform_9(%arg0: i32) -> (i32, i32) {
    %c0_i32 = arith.constant 0 : i32
    %c0_i32_0 = arith.constant 0 : i32
    return %arg0, %c0_i32 : i32, i32
  }
}

</mosaic_0001>

<bundles_post_ra>
// kernel: sae_forward.1
= control target key start
LH: loop header
LB: loop body
LE: loop exit
PB: predicated region body
PF: predicated region fallthrough
CT: control target
= control target key end

     0   :  { %s1984_s30 = smov 0   ;;  %s2308_s0 = inlined_call_operand.vmem [shape: f32[320,32], index: 0, kind: input, shape index: {}]   ;;  %s2309_s1 = inlined_call_operand.vmem [shape: bf16[32,128], index: 1, kind: input, shape index: {}]   ;;  %s2310_s2 = inlined_call_operand.vmem [shape: f32[1,128], index: 2, kind: input, shape index: {}]   ;;  %s2311_s3 = inlined_call_operand.vmem [shape: bf16[128,128], index: 3, kind: input, shape index: {}]   ;;  %s2312_s4 = inlined_call_operand.vmem [shape: f32[1,128], index: 4, kind: input, shape index: {}]   ;;  %s2313_s5 = inlined_call_operand.vmem [shape: bf16[128,128], index: 5, kind: input, shape index: {}]   ;;  %s2314_s6 = inlined_call_operand.vmem [shape: f32[1,128], index: 6, kind: input, shape index: {}]   ;;  %s2315_s7 = inlined_call_operand.vmem [shape: bf16[128,8], index: 7, kind: input, shape index: {}]   ;;  %s2316_s8 = inlined_call_operand.vmem [shape: f32[1,8], index: 8, kind: input, shape index: {}]   ;;  %s2317_s9 = inlined_call_operand.vmem [shape: f32[320,8], index: 9, kind: output, shape index: {}]  }
   0x1 LB: > { %s1570_s10 = sadd.s32 4294967295, %s1932_s30   ;;  %p1574_p0 = scmp.ge.s32.totalorder %s1932_s30, 1  ;;  %s1932_s30 = sphi %s1984_s30, %s19_s30  }
   0x2   : > { %p288_p1 = scmp.lt.s32.totalorder %s1932_s30, 5 }
   0x4   : > { %p289_p2 = pnand %p1574_p0, %p288_p1 }
   0x5   : > { %s324_s13 = smul.u32 (!%p289_p2), 10, %s1570_s10 }
   0x6   : > { %292 = sbr.rel (%p289_p2) target bundleno = 758 (0x2f6), region = 56 }
   0x7   : > { %p325_p3 = scmp.lt.s32.totalorder (!%p289_p2), %s324_s13, 39 }
   0xb   : > { %v1729_v0 = vld [vmem:[%s2309_s1 + $0x8] sm:$0xff]  ;;  %v1728_v1 = vld [vmem:[%s2309_s1] sm:$0xff]  ;;  %s2343_s13 = smov (!%p325_p3, %s324_s13), 39  ;;  %vm372_vm0 = vcmask 261120   ;;  %v1737_v17 = vld [vmem:[%s2311_s3 + $0x38] sm:$0xff] }
   0xc   : > { %394 = vmatpush.bf16.msra.mxu0 %v1729_v0  ;;  %s1575_s16 = sshll.u32 %s2343_s13, 3  ;;  %685 = vmatpush.bf16.msra.mxu1 %v1737_v17  ;;  %v1736_v18 = vld [vmem:[%s2311_s3 + $0x30] sm:$0xff]  ;;  %v1735_v19 = vld [vmem:[%s2311_s3 + $0x28] sm:$0xff]  ;;  %v1734_v20 = vld [vmem:[%s2311_s3 + $0x20] sm:$0xff] }
   0xd   : > { %s328_s19 = scalar_lea.vmem %s2308_s0, %s1575_s16  ;;  %v1733_v21 = vld [vmem:[%s2311_s3 + $0x18] sm:$0xff]  ;;  %v1732_v22 = vld [vmem:[%s2311_s3 + $0x10] sm:$0xff]  ;;  %v2032_v23 = vld [vmem:[%s2310_s2] ss:$0 sm:$0xff]  ;;  %s2277_s24 = scalar_lea.vmem %s2317_s9, %s1575_s16 }
   0xe   : > { %v337_v2 = vld [vmem:[%s328_s19] sm:$0xff]  ;;  %v338_v3 = vld [vmem:[%s328_s19 + $0x8] sm:$0xff]  ;;  %v339_v5 = vld [vmem:[%s328_s19 + $0x10] sm:$0xff] }
   0xf   : > { %v347_v4 = vpack.c.bf16 %v338_v3, %v337_v2  ;;  %v340_v6 = vld [vmem:[%s328_s19 + $0x18] sm:$0xff]  ;;  %v341_v8 = vld [vmem:[%s328_s19 + $0x20] sm:$0xff]  ;;  %v342_v9 = vld [vmem:[%s328_s19 + $0x28] sm:$0xff] }
  0x10   : > { %395 = vmatpush.bf16.msra.mxu0 %v1728_v1  ;;  %v348_v7 = vpack.c.bf16 %v340_v6, %v339_v5  ;;  %v349_v10 = vpack.c.bf16 %v342_v9, %v341_v8  ;;  %v343_v11 = vld [vmem:[%s328_s19 + $0x30] sm:$0xff]  ;;  %v344_v12 = vld [vmem:[%s328_s19 + $0x38] sm:$0xff]  ;;  %v345_v14 = vld [vmem:[%s328_s19 + $0x40] sm:$0xff]  ;;  %686 = vmatpush.bf16.msra.mxu1 %v1736_v18 }
  0x11   : > { %v350_v13 = vpack.c.bf16 %v344_v12, %v343_v11  ;;  %v346_v15 = vld [vmem:[%s328_s19 + $0x48] sm:$0xff]  ;;  %v1730_v28 = vld [vmem:[%s2311_s3] sm:$0xff] }
  0x12   : > { %v351_v16 = vpack.c.bf16 %v346_v15, %v345_v14  ;;  %v1731_v25 = vld [vmem:[%s2311_s3 + $0x8] sm:$0xff] }
  0x13   : > { %1585 = vmatmul.msk.bf16.vlgmr.msra.gmra.mxu0 %vm372_vm0, %v347_v4 }
  0x14   : > { %687 = vmatpush.bf16.msra.mxu1 %v1735_v19 }
  0x18   : > { %688 = vmatpush.bf16.msra.mxu1 %v1734_v20 }
  0x1c   : > { %689 = vmatpush.bf16.msra.mxu1 %v1733_v21 }
  0x20   : > { %690 = vmatpush.bf16.msra.mxu1 %v1732_v22 }
  0x23   : > { %1586 = vmatmul.msk.bf16.gmra.mxu0 %vm372_vm0, %v348_v7 }
  0x24   : > { %691 = vmatpush.bf16.msra.mxu1 %v1731_v25 }
  0x28   : > { %692 = vmatpush.bf16.msra.mxu1 %v1730_v28 }
  0x33   : > { %1587 = vmatmul.msk.bf16.gmra.mxu0 %vm372_vm0, %v349_v10 }
  0x43   : > { %1588 = vmatmul.msk.bf16.gmra.mxu0 %vm372_vm0, %v350_v13 }
  0x53   : > { %1589 = vmatmul.msk.bf16.gmra.mxu0 %vm372_vm0, %v351_v16 }
  0x90   : > { %v397_v24 = vpop.f32.mrf.mxu0 }
  0x91   : > { %v398_v26 = vadd.f32 %v2032_v23, %v397_v24 }
  0x93   : > { %v1590_v27 = vmul.f32 -1.442695, %v398_v26 }
  0x95   : > { %1766 = vpow2.f32 %v1590_v27 }
  0x98   : > { %v399_v29 = vpop.f32.mrf.mxu0 }
  0x99   : > { %v400_v30 = vadd.f32 %v2032_v23, %v399_v29 }
  0x9b   : > { %v1767_v31 = vpop.eup %1766  ;;  %v1591_v32 = vmul.f32 -1.442695, %v400_v30 }
  0x9c   : > { %v452_v33 = vadd.f32 1.0, %v1767_v31 }
  0x9d   : > { %1768 = vpow2.f32 %v1591_v32 }
  0x9e   : > { %1770 = vrcp.f32 %v452_v33  ;;  %vm467_vm2 = vweird.f32 %v452_v33  ;;  %v471_v53 = vand.u32 2147483647, %v452_v33  ;;  %v473_v54 = vand.u32 2147483648, %v452_v33 }
  0xa0   : > { %v402_v34 = vpop.f32.mrf.mxu0  ;;  %vm472_vm6 = vcmp.eq.f32.partialorder %v471_v53, 8.507059e+37  ;;  %v474_v2 = vor.u32 1.1754944e-38, %v473_v54 }
  0xa1   : > { %v403_v35 = vadd.f32 %v2032_v23, %v402_v34 }
  0xa3   : > { %v1769_v36 = vpop.eup %1768  ;;  %v1592_v37 = vmul.f32 -1.442695, %v403_v35 }
  0xa4   : > { %v1771_v38 = vpop.eup %1770  ;;  %v453_v39 = vadd.f32 1.0, %v1769_v36 }
  0xa5   : > { %1772 = vpow2.f32 %v1592_v37  ;;  %v463_v40 = vmul.f32 %v1771_v38, %v452_v33  ;;  %vm468_vm1 = vweird.f32 %v1771_v38 }
  0xa6   : > { %1774 = vrcp.f32 %v453_v39  ;;  %v488_v55 = vand.u32 2147483648, %v453_v39  ;;  %v486_v58 = vand.u32 2147483647, %v453_v39  ;;  %vm2048_vm4 = vmor %vm467_vm2, %vm468_vm1  ;;  %vm482_vm5 = vweird.f32 %v453_v39 }
  0xa7   : > { %v464_v41 = vsub.f32 1.0, %v463_v40 }
  0xa8   : > { %v404_v42 = vpop.f32.mrf.mxu0  ;;  %v489_v3 = vor.u32 1.1754944e-38, %v488_v55  ;;  %vm487_vm8 = vcmp.eq.f32.partialorder %v486_v58, 8.507059e+37 }
  0xa9   : > { %v405_v43 = vadd.f32 %v2032_v23, %v404_v42  ;;  %v465_v46 = vmul.f32 %v1771_v38, %v464_v41 }
  0xab   : > { %v1773_v44 = vpop.eup %1772  ;;  %v1593_v45 = vmul.f32 -1.442695, %v405_v43  ;;  %v466_v50 = vadd.f32 %v1771_v38, %v465_v46 }
  0xac   : > { %v1775_v47 = vpop.eup %1774  ;;  %v2044_v48 = vadd.f32 1.0, %v1773_v44 }
  0xad   : > { %1776 = vpow2.f32 %v1593_v45  ;;  %v478_v49 = vmul.f32 %v1775_v47, %v453_v39  ;;  %vm483_vm3 = vweird.f32 %v1775_v47  ;;  %v470_v62 = vsel %vm2048_vm4, %v1771_v38, %v466_v50 }
  0xae   : > { %1778 = vrcp.f32 %v2044_v48  ;;  %vm484_vm7 = vmor %vm482_vm5, %vm483_vm3  ;;  %v475_v6 = vsel %vm472_vm6, %v474_v2, %v470_v62  ;;  %vm497_vm10 = vweird.f32 %v2044_v48  ;;  %v501_v21 = vand.u32 2147483647, %v2044_v48 }
  0xaf   : > { %v479_v51 = vsub.f32 1.0, %v478_v49  ;;  %v503_v22 = vand.u32 2147483648, %v2044_v48 }
  0xb0   : > { %v407_v52 = vpop.f32.mrf.mxu0  ;;  %vm502_vm14 = vcmp.eq.f32.partialorder %v501_v21, 8.507059e+37 }
  0xb1   : > { %v408_v56 = vadd.f32 %v2032_v23, %v407_v52  ;;  %v480_v57 = vmul.f32 %v1775_v47, %v479_v51  ;;  %v504_v35 = vor.u32 1.1754944e-38, %v503_v22 }
  0xb3   : > { %v1777_v60 = vpop.eup %1776  ;;  %v1594_v61 = vmul.f32 -1.442695, %v408_v56  ;;  %v481_v63 = vadd.f32 %v1775_v47, %v480_v57 }
  0xb4   : > { %v1779_v0 = vpop.eup %1778  ;;  %v455_v1 = vadd.f32 1.0, %v1777_v60  ;;  %v1743_v60 = vld [vmem:[%s2313_s5 + $0x28] sm:$0xff] }
  0xb5   : > { %1780 = vpow2.f32 %v1594_v61  ;;  %v485_v4 = vsel %vm484_vm7, %v1775_v47, %v481_v63  ;;  %v493_v5 = vmul.f32 %v1779_v0, %v2044_v48  ;;  %vm498_vm9 = vweird.f32 %v1779_v0 }
  0xb6   : > { %1782 = vrcp.f32 %v455_v1  ;;  %v490_v7 = vsel %vm487_vm8, %v489_v3, %v485_v4  ;;  %v518_v24 = vand.u32 2147483648, %v455_v1  ;;  %v516_v27 = vand.u32 2147483647, %v455_v1  ;;  %vm2063_vm12 = vmor %vm497_vm10, %vm498_vm9 }
  0xb7   : > { %v612_v8 = vpack.c.bf16 %v490_v7, %v475_v6  ;;  %v494_v9 = vsub.f32 1.0, %v493_v5  ;;  %vm512_vm13 = vweird.f32 %v455_v1 }
  0xb8   : > { %v409_v10 = vpop.f32.mrf.mxu0  ;;  %v519_v36 = vor.u32 1.1754944e-38, %v518_v24  ;;  %vm517_vm0 = vcmp.eq.f32.partialorder %v516_v27, 8.507059e+37 }
  0xb9   : > { %v410_v11 = vadd.f32 %v2032_v23, %v409_v10  ;;  %693 = vmatmul.bf16.vlgmr.msra.gmra.mxu1 %v612_v8  ;;  %v495_v14 = vmul.f32 %v1779_v0, %v494_v9 }
  0xbb   : > { %v1781_v12 = vpop.eup %1780  ;;  %v1595_v13 = vmul.f32 -1.442695, %v410_v11  ;;  %v496_v18 = vadd.f32 %v1779_v0, %v495_v14 }
  0xbc   : > { %v1783_v15 = vpop.eup %1782  ;;  %v2056_v16 = vadd.f32 1.0, %v1781_v12 }
  0xbd   : > { %1784 = vpow2.f32 %v1595_v13  ;;  %v508_v17 = vmul.f32 %v1783_v15, %v455_v1  ;;  %vm513_vm11 = vweird.f32 %v1783_v15  ;;  %v500_v31 = vsel %vm2063_vm12, %v1779_v0, %v496_v18 }
  0xbe   : > { %1786 = vrcp.f32 %v2056_v16  ;;  %vm514_vm15 = vmor %vm512_vm13, %vm513_vm11  ;;  %v505_v39 = vsel %vm502_vm14, %v504_v35, %v500_v31  ;;  %vm527_vm2 = vweird.f32 %v2056_v16  ;;  %v531_v54 = vand.u32 2147483647, %v2056_v16 }
  0xbf   : > { %v509_v19 = vsub.f32 1.0, %v508_v17  ;;  %v533_v55 = vand.u32 2147483648, %v2056_v16 }
  0xc0   : > { %v412_v20 = vpop.f32.mrf.mxu0  ;;  %vm532_vm6 = vcmp.eq.f32.partialorder %v531_v54, 8.507059e+37 }
  0xc1   : > { %v413_v25 = vadd.f32 %v2032_v23, %v412_v20  ;;  %v510_v26 = vmul.f32 %v1783_v15, %v509_v19  ;;  %v534_v3 = vor.u32 1.1754944e-38, %v533_v55 }
  0xc3   : > { %v1785_v29 = vpop.eup %1784  ;;  %v1596_v30 = vmul.f32 -1.442695, %v413_v25  ;;  %v511_v32 = vadd.f32 %v1783_v15, %v510_v26 }
  0xc4   : > { %v1787_v33 = vpop.eup %1786  ;;  %v457_v34 = vadd.f32 1.0, %v1785_v29 }
  0xc5   : > { %1788 = vpow2.f32 %v1596_v30  ;;  %v515_v37 = vsel %vm514_vm15, %v1783_v15, %v511_v32  ;;  %v523_v38 = vmul.f32 %v1787_v33, %v2056_v16  ;;  %vm528_vm1 = vweird.f32 %v1787_v33 }
  0xc6   : > { %1790 = vrcp.f32 %v457_v34  ;;  %v520_v40 = vsel %vm517_vm0, %v519_v36, %v515_v37  ;;  %v548_v56 = vand.u32 2147483648, %v457_v34  ;;  %v546_v59 = vand.u32 2147483647, %v457_v34  ;;  %vm2078_vm4 = vmor %vm527_vm2, %vm528_vm1 }
  0xc7   : > { %v613_v41 = vpack.c.bf16 %v520_v40, %v505_v39  ;;  %v524_v42 = vsub.f32 1.0, %v523_v38  ;;  %vm542_vm5 = vweird.f32 %v457_v34 }
  0xc8   : > { %v414_v43 = vpop.f32.mrf.mxu0  ;;  %v549_v4 = vor.u32 1.1754944e-38, %v548_v56  ;;  %vm547_vm8 = vcmp.eq.f32.partialorder %v546_v59, 8.507059e+37  ;;  %v1744_v59 = vld [vmem:[%s2313_s5 + $0x30] sm:$0xff] }
  0xc9   : > { %v415_v44 = vadd.f32 %v2032_v23, %v414_v43  ;;  %698 = vmatmul.bf16.gmra.mxu1 %v613_v41  ;;  %v525_v47 = vmul.f32 %v1787_v33, %v524_v42 }
  0xcb   : > { %v1789_v45 = vpop.eup %1788  ;;  %v1597_v46 = vmul.f32 -1.442695, %v415_v44  ;;  %v526_v51 = vadd.f32 %v1787_v33, %v525_v47 }
  0xcc   : > { %v1791_v48 = vpop.eup %1790  ;;  %v2071_v49 = vadd.f32 1.0, %v1789_v45 }
  0xcd   : > { %1792 = vpow2.f32 %v1597_v46  ;;  %v538_v50 = vmul.f32 %v1791_v48, %v457_v34  ;;  %vm543_vm3 = vweird.f32 %v1791_v48  ;;  %v530_v63 = vsel %vm2078_vm4, %v1787_v33, %v526_v51 }
  0xce   : > { %1794 = vrcp.f32 %v2071_v49  ;;  %vm544_vm7 = vmor %vm542_vm5, %vm543_vm3  ;;  %v535_v7 = vsel %vm532_vm6, %v534_v3, %v530_v63  ;;  %vm557_vm10 = vweird.f32 %v2071_v49  ;;  %v563_v21 = vand.u32 2147483648, %v2071_v49  ;;  %v2113_v63 = vld [vmem:[%s2312_s4] ss:$0 sm:$0xff]  ;;  %v1739_v3 = vld [vmem:[%s2313_s5 + $0x8] sm:$0xff] }
  0xcf   : > { %v539_v52 = vsub.f32 1.0, %v538_v50  ;;  %v561_v24 = vand.u32 2147483647, %v2071_v49 }
  0xd0   : > { %v417_v53 = vpop.f32.mrf.mxu0  ;;  %v564_v32 = vor.u32 1.1754944e-38, %v563_v21 }
  0xd1   : > { %v418_v57 = vadd.f32 %v2032_v23, %v417_v53  ;;  %v540_v58 = vmul.f32 %v1791_v48, %v539_v52  ;;  %vm562_vm15 = vcmp.eq.f32.partialorder %v561_v24, 8.507059e+37 }
  0xd3   : > { %v1793_v61 = vpop.eup %1792  ;;  %v1598_v62 = vmul.f32 -1.442695, %v418_v57  ;;  %v541_v0 = vadd.f32 %v1791_v48, %v540_v58  ;;  %v1745_v58 = vld [vmem:[%s2313_s5 + $0x38] sm:$0xff] }
  0xd4   : > { %v1795_v1 = vpop.eup %1794  ;;  %v459_v2 = vadd.f32 1.0, %v1793_v61  ;;  %982 = vmatpush.bf16.msra.mxu2 %v1745_v58  ;;  %v1742_v61 = vld [vmem:[%s2313_s5 + $0x20] sm:$0xff] }
  0xd5   : > { %1796 = vpow2.f32 %v1598_v62  ;;  %v545_v5 = vsel %vm544_vm7, %v1791_v48, %v541_v0  ;;  %v553_v6 = vmul.f32 %v1795_v1, %v2071_v49  ;;  %vm558_vm9 = vweird.f32 %v1795_v1  ;;  %v1741_v62 = vld [vmem:[%s2313_s5 + $0x18] sm:$0xff]  ;;  %v1740_v0 = vld [vmem:[%s2313_s5 + $0x10] sm:$0xff] }
  0xd6   : > { %1798 = vrcp.f32 %v459_v2  ;;  %v550_v8 = vsel %vm547_vm8, %v549_v4, %v545_v5  ;;  %v578_v22 = vand.u32 2147483648, %v459_v2  ;;  %v576_v25 = vand.u32 2147483647, %v459_v2  ;;  %vm2089_vm12 = vmor %vm557_vm10, %vm558_vm9  ;;  %v1738_v5 = vld [vmem:[%s2313_s5] sm:$0xff] }
  0xd7   : > { %v614_v9 = vpack.c.bf16 %v550_v8, %v535_v7  ;;  %v554_v10 = vsub.f32 1.0, %v553_v6  ;;  %vm572_vm13 = vweird.f32 %v459_v2 }
  0xd8   : > { %v419_v11 = vpop.f32.mrf.mxu0  ;;  %v579_v33 = vor.u32 1.1754944e-38, %v578_v22  ;;  %vm577_vm0 = vcmp.eq.f32.partialorder %v576_v25, 8.507059e+37  ;;  %983 = vmatpush.bf16.msra.mxu2 %v1744_v59 }
  0xd9   : > { %v420_v12 = vadd.f32 %v2032_v23, %v419_v11  ;;  %703 = vmatmul.bf16.gmra.mxu1 %v614_v9  ;;  %v555_v15 = vmul.f32 %v1795_v1, %v554_v10 }
  0xdb   : > { %v1797_v13 = vpop.eup %1796  ;;  %v1599_v14 = vmul.f32 -1.442695, %v420_v12  ;;  %v556_v19 = vadd.f32 %v1795_v1, %v555_v15 }
  0xdc   : > { %v1799_v16 = vpop.eup %1798  ;;  %v460_v17 = vadd.f32 1.0, %v1797_v13  ;;  %984 = vmatpush.bf16.msra.mxu2 %v1743_v60 }
  0xdd   : > { %1800 = vpow2.f32 %v1599_v14  ;;  %v568_v18 = vmul.f32 %v1799_v16, %v459_v2  ;;  %vm573_vm11 = vweird.f32 %v1799_v16  ;;  %v560_v28 = vsel %vm2089_vm12, %v1795_v1, %v556_v19 }
  0xde   : > { %1802 = vrcp.f32 %v460_v17  ;;  %vm574_vm14 = vmor %vm572_vm13, %vm573_vm11  ;;  %v565_v36 = vsel %vm562_vm15, %v564_v32, %v560_v28  ;;  %vm587_vm2 = vweird.f32 %v460_v17  ;;  %v593_v45 = vand.u32 2147483648, %v460_v17 }
  0xdf   : > { %v569_v20 = vsub.f32 1.0, %v568_v18  ;;  %v591_v47 = vand.u32 2147483647, %v460_v17 }
  0xe0   : > { %v594_v52 = vor.u32 1.1754944e-38, %v593_v45  ;;  %985 = vmatpush.bf16.msra.mxu2 %v1742_v61 }
  0xe1   : > { %v570_v23 = vmul.f32 %v1799_v16, %v569_v20  ;;  %vm592_vm7 = vcmp.eq.f32.partialorder %v591_v47, 8.507059e+37 }
  0xe3   : > { %v1801_v27 = vpop.eup %1800  ;;  %v571_v29 = vadd.f32 %v1799_v16, %v570_v23 }
  0xe4   : > { %v1803_v30 = vpop.eup %1802  ;;  %v461_v31 = vadd.f32 1.0, %v1801_v27  ;;  %986 = vmatpush.bf16.msra.mxu2 %v1741_v62 }
  0xe5   : > { %v575_v34 = vsel %vm574_vm14, %v1799_v16, %v571_v29  ;;  %v583_v35 = vmul.f32 %v1803_v30, %v460_v17  ;;  %vm588_vm1 = vweird.f32 %v1803_v30 }
  0xe6   : > { %1804 = vrcp.f32 %v461_v31  ;;  %v580_v37 = vsel %vm577_vm0, %v579_v33, %v575_v34  ;;  %v608_v46 = vand.u32 2147483648, %v461_v31  ;;  %v606_v49 = vand.u32 2147483647, %v461_v31  ;;  %vm589_vm4 = vmor %vm587_vm2, %vm588_vm1 }
  0xe7   : > { %v615_v38 = vpack.c.bf16 %v580_v37, %v565_v36  ;;  %v584_v39 = vsub.f32 1.0, %v583_v35  ;;  %vm602_vm5 = vweird.f32 %v461_v31 }
  0xe8   : > { %v609_v53 = vor.u32 1.1754944e-38, %v608_v46  ;;  %vm607_vm8 = vcmp.eq.f32.partialorder %v606_v49, 8.507059e+37  ;;  %987 = vmatpush.bf16.msra.mxu2 %v1740_v0 }
  0xe9   : > { %708 = vmatmul.bf16.gmra.mxu1 %v615_v38  ;;  %v585_v40 = vmul.f32 %v1803_v30, %v584_v39 }
  0xeb   : > { %v586_v43 = vadd.f32 %v1803_v30, %v585_v40 }
  0xec   : > { %v1805_v41 = vpop.eup %1804  ;;  %988 = vmatpush.bf16.msra.mxu2 %v1739_v3 }
  0xed   : > { %v598_v42 = vmul.f32 %v1805_v41, %v461_v31  ;;  %vm603_vm3 = vweird.f32 %v1805_v41  ;;  %v590_v50 = vsel %vm589_vm4, %v1803_v30, %v586_v43 }
  0xee   : > { %vm604_vm6 = vmor %vm602_vm5, %vm603_vm3  ;;  %v595_v55 = vsel %vm592_vm7, %v594_v52, %v590_v50 }
  0xef   : > { %v599_v44 = vsub.f32 1.0, %v598_v42 }
  0xf0   : > { %989 = vmatpush.bf16.msra.mxu2 %v1738_v5 }
  0xf1   : > { %v600_v48 = vmul.f32 %v1805_v41, %v599_v44 }
  0xf3   : > { %v601_v51 = vadd.f32 %v1805_v41, %v600_v48 }
  0xf5   : > { %v605_v54 = vsel %vm604_vm6, %v1805_v41, %v601_v51 }
  0xf6   : > { %v610_v56 = vsel %vm607_vm8, %v609_v53, %v605_v54 }
  0xf7   : > { %v616_v57 = vpack.c.bf16 %v610_v56, %v595_v55 }
  0xf9   : > { %713 = vmatmul.bf16.gmra.mxu1 %v616_v57 }
 0x136   : > { %v694_v1 = vpop.f32.mrf.mxu1 }
 0x137   : > { %v695_v2 = vadd.f32 %v2113_v63, %v694_v1 }
 0x139   : > { %v1632_v4 = vmul.f32 -1.442695, %v695_v2 }
 0x13b   : > { %1806 = vpow2.f32 %v1632_v4 }
 0x13e   : > { %v696_v6 = vpop.f32.mrf.mxu1 }
 0x13f   : > { %v697_v7 = vadd.f32 %v2113_v63, %v696_v6 }
 0x141   : > { %v1807_v8 = vpop.eup %1806  ;;  %v1633_v9 = vmul.f32 -1.442695, %v697_v7 }
 0x142   : > { %v749_v10 = vadd.f32 1.0, %v1807_v8 }
 0x143   : > { %1808 = vpow2.f32 %v1633_v9 }
 0x144   : > { %1810 = vrcp.f32 %v749_v10  ;;  %vm764_vm10 = vweird.f32 %v749_v10  ;;  %v768_v30 = vand.u32 2147483647, %v749_v10  ;;  %v770_v31 = vand.u32 2147483648, %v749_v10 }
 0x146   : > { %v699_v11 = vpop.f32.mrf.mxu1  ;;  %vm769_vm14 = vcmp.eq.f32.partialorder %v768_v30, 8.507059e+37  ;;  %v771_v43 = vor.u32 1.1754944e-38, %v770_v31 }
 0x147   : > { %v700_v12 = vadd.f32 %v2113_v63, %v699_v11 }
 0x149   : > { %v1809_v13 = vpop.eup %1808  ;;  %v1634_v14 = vmul.f32 -1.442695, %v700_v12 }
 0x14a   : > { %v1811_v15 = vpop.eup %1810  ;;  %v750_v16 = vadd.f32 1.0, %v1809_v13 }
 0x14b   : > { %1812 = vpow2.f32 %v1634_v14  ;;  %v760_v17 = vmul.f32 %v1811_v15, %v749_v10  ;;  %vm765_vm9 = vweird.f32 %v1811_v15 }
 0x14c   : > { %1814 = vrcp.f32 %v750_v16  ;;  %v785_v32 = vand.u32 2147483648, %v750_v16  ;;  %v783_v35 = vand.u32 2147483647, %v750_v16  ;;  %vm2132_vm12 = vmor %vm764_vm10, %vm765_vm9  ;;  %vm779_vm13 = vweird.f32 %v750_v16 }
 0x14d   : > { %v761_v18 = vsub.f32 1.0, %v760_v17 }
 0x14e   : > { %v701_v19 = vpop.f32.mrf.mxu1  ;;  %v786_v44 = vor.u32 1.1754944e-38, %v785_v32  ;;  %vm784_vm0 = vcmp.eq.f32.partialorder %v783_v35, 8.507059e+37 }
 0x14f   : > { %v702_v20 = vadd.f32 %v2113_v63, %v701_v19  ;;  %v762_v24 = vmul.f32 %v1811_v15, %v761_v18 }
 0x151   : > { %v1813_v21 = vpop.eup %1812  ;;  %v1635_v22 = vmul.f32 -1.442695, %v702_v20  ;;  %v763_v27 = vadd.f32 %v1811_v15, %v762_v24 }
 0x152   : > { %v1815_v23 = vpop.eup %1814  ;;  %v2128_v25 = vadd.f32 1.0, %v1813_v21 }
 0x153   : > { %1816 = vpow2.f32 %v1635_v22  ;;  %v775_v26 = vmul.f32 %v1815_v23, %v750_v16  ;;  %vm780_vm11 = vweird.f32 %v1815_v23  ;;  %v767_v39 = vsel %vm2132_vm12, %v1811_v15, %v763_v27 }
 0x154   : > { %1818 = vrcp.f32 %v2128_v25  ;;  %vm781_vm15 = vmor %vm779_vm13, %vm780_vm11  ;;  %v772_v47 = vsel %vm769_vm14, %v771_v43, %v767_v39  ;;  %vm794_vm2 = vweird.f32 %v2128_v25  ;;  %v798_v62 = vand.u32 2147483647, %v2128_v25 }
 0x155   : > { %v776_v28 = vsub.f32 1.0, %v775_v26  ;;  %v800_v0 = vand.u32 2147483648, %v2128_v25 }
 0x156   : > { %v704_v29 = vpop.f32.mrf.mxu1  ;;  %vm799_vm6 = vcmp.eq.f32.partialorder %v798_v62, 8.507059e+37 }
 0x157   : > { %v705_v33 = vadd.f32 %v2113_v63, %v704_v29  ;;  %v777_v34 = vmul.f32 %v1815_v23, %v776_v28  ;;  %v801_v12 = vor.u32 1.1754944e-38, %v800_v0 }
 0x159   : > { %v1817_v37 = vpop.eup %1816  ;;  %v1636_v38 = vmul.f32 -1.442695, %v705_v33  ;;  %v778_v40 = vadd.f32 %v1815_v23, %v777_v34 }
 0x15a   : > { %v1819_v41 = vpop.eup %1818  ;;  %v752_v42 = vadd.f32 1.0, %v1817_v37  ;;  %v1751_v37 = vld [vmem:[%s2315_s7 + $0x28] sm:$0xff] }
 0x15b   : > { %1820 = vpow2.f32 %v1636_v38  ;;  %v782_v45 = vsel %vm781_vm15, %v1815_v23, %v778_v40  ;;  %v790_v46 = vmul.f32 %v1819_v41, %v2128_v25  ;;  %vm795_vm1 = vweird.f32 %v1819_v41 }
 0x15c   : > { %1822 = vrcp.f32 %v752_v42  ;;  %v787_v48 = vsel %vm784_vm0, %v786_v44, %v782_v45  ;;  %v815_v1 = vand.u32 2147483648, %v752_v42  ;;  %v813_v4 = vand.u32 2147483647, %v752_v42  ;;  %vm2147_vm4 = vmor %vm794_vm2, %vm795_vm1 }
 0x15d   : > { %v909_v49 = vpack.c.bf16 %v787_v48, %v772_v47  ;;  %v791_v50 = vsub.f32 1.0, %v790_v46  ;;  %vm809_vm5 = vweird.f32 %v752_v42 }
 0x15e   : > { %v706_v51 = vpop.f32.mrf.mxu1  ;;  %v816_v13 = vor.u32 1.1754944e-38, %v815_v1  ;;  %vm814_vm8 = vcmp.eq.f32.partialorder %v813_v4, 8.507059e+37 }
 0x15f   : > { %v707_v52 = vadd.f32 %v2113_v63, %v706_v51  ;;  %990 = vmatmul.bf16.vlgmr.msra.gmra.mxu2 %v909_v49  ;;  %v792_v55 = vmul.f32 %v1819_v41, %v791_v50 }
 0x161   : > { %v1821_v53 = vpop.eup %1820  ;;  %v1637_v54 = vmul.f32 -1.442695, %v707_v52  ;;  %v793_v59 = vadd.f32 %v1819_v41, %v792_v55 }
 0x162   : > { %v1823_v56 = vpop.eup %1822  ;;  %v2140_v57 = vadd.f32 1.0, %v1821_v53 }
 0x163   : > { %1824 = vpow2.f32 %v1637_v54  ;;  %v805_v58 = vmul.f32 %v1823_v56, %v752_v42  ;;  %vm810_vm3 = vweird.f32 %v1823_v56  ;;  %v797_v8 = vsel %vm2147_vm4, %v1819_v41, %v793_v59 }
 0x164   : > { %1826 = vrcp.f32 %v2140_v57  ;;  %vm811_vm7 = vmor %vm809_vm5, %vm810_vm3  ;;  %v802_v16 = vsel %vm799_vm6, %v801_v12, %v797_v8  ;;  %vm824_vm10 = vweird.f32 %v2140_v57  ;;  %v828_v31 = vand.u32 2147483647, %v2140_v57 }
 0x165   : > { %v806_v60 = vsub.f32 1.0, %v805_v58  ;;  %v830_v32 = vand.u32 2147483648, %v2140_v57 }
 0x166   : > { %v709_v61 = vpop.f32.mrf.mxu1  ;;  %vm829_vm14 = vcmp.eq.f32.partialorder %v828_v31, 8.507059e+37 }
 0x167   : > { %v710_v2 = vadd.f32 %v2113_v63, %v709_v61  ;;  %v807_v3 = vmul.f32 %v1823_v56, %v806_v60  ;;  %v831_v44 = vor.u32 1.1754944e-38, %v830_v32 }
 0x169   : > { %v1825_v6 = vpop.eup %1824  ;;  %v1638_v7 = vmul.f32 -1.442695, %v710_v2  ;;  %v808_v9 = vadd.f32 %v1823_v56, %v807_v3 }
 0x16a   : > { %v1827_v10 = vpop.eup %1826  ;;  %v754_v11 = vadd.f32 1.0, %v1825_v6 }
 0x16b   : > { %1828 = vpow2.f32 %v1638_v7  ;;  %v812_v14 = vsel %vm811_vm7, %v1823_v56, %v808_v9  ;;  %v820_v15 = vmul.f32 %v1827_v10, %v2140_v57  ;;  %vm825_vm9 = vweird.f32 %v1827_v10 }
 0x16c   : > { %1830 = vrcp.f32 %v754_v11  ;;  %v817_v17 = vsel %vm814_vm8, %v816_v13, %v812_v14  ;;  %v845_v33 = vand.u32 2147483648, %v754_v11  ;;  %v843_v36 = vand.u32 2147483647, %v754_v11  ;;  %vm2162_vm12 = vmor %vm824_vm10, %vm825_vm9 }
 0x16d   : > { %v910_v18 = vpack.c.bf16 %v817_v17, %v802_v16  ;;  %v821_v19 = vsub.f32 1.0, %v820_v15  ;;  %vm839_vm13 = vweird.f32 %v754_v11 }
 0x16e   : > { %v711_v20 = vpop.f32.mrf.mxu1  ;;  %v846_v45 = vor.u32 1.1754944e-38, %v845_v33  ;;  %vm844_vm0 = vcmp.eq.f32.partialorder %v843_v36, 8.507059e+37  ;;  %v1752_v36 = vld [vmem:[%s2315_s7 + $0x30] sm:$0xff] }
 0x16f   : > { %v712_v21 = vadd.f32 %v2113_v63, %v711_v20  ;;  %995 = vmatmul.bf16.gmra.mxu2 %v910_v18  ;;  %v822_v23 = vmul.f32 %v1827_v10, %v821_v19 }
 0x171   : > { %v1829_v22 = vpop.eup %1828  ;;  %v1639_v24 = vmul.f32 -1.442695, %v712_v21  ;;  %v823_v28 = vadd.f32 %v1827_v10, %v822_v23 }
 0x172   : > { %v1831_v25 = vpop.eup %1830  ;;  %v2155_v26 = vadd.f32 1.0, %v1829_v22 }
 0x173   : > { %1832 = vpow2.f32 %v1639_v24  ;;  %v835_v27 = vmul.f32 %v1831_v25, %v754_v11  ;;  %vm840_vm11 = vweird.f32 %v1831_v25  ;;  %v827_v40 = vsel %vm2162_vm12, %v1827_v10, %v823_v28 }
 0x174   : > { %1834 = vrcp.f32 %v2155_v26  ;;  %vm841_vm15 = vmor %vm839_vm13, %vm840_vm11  ;;  %v832_v48 = vsel %vm829_vm14, %v831_v44, %v827_v40  ;;  %vm854_vm2 = vweird.f32 %v2155_v26  ;;  %v860_v62 = vand.u32 2147483648, %v2155_v26  ;;  %v2197_v40 = vld [vmem:[%s2314_s6] ss:$0 sm:$0xff]  ;;  %v1747_v44 = vld [vmem:[%s2315_s7 + $0x8] sm:$0xff] }
 0x175   : > { %v836_v29 = vsub.f32 1.0, %v835_v27  ;;  %v858_v1 = vand.u32 2147483647, %v2155_v26 }
 0x176   : > { %v714_v30 = vpop.f32.mrf.mxu1  ;;  %v861_v9 = vor.u32 1.1754944e-38, %v860_v62 }
 0x177   : > { %v715_v34 = vadd.f32 %v2113_v63, %v714_v30  ;;  %v837_v35 = vmul.f32 %v1831_v25, %v836_v29  ;;  %vm859_vm7 = vcmp.eq.f32.partialorder %v858_v1, 8.507059e+37 }
 0x179   : > { %v1833_v38 = vpop.eup %1832  ;;  %v1640_v39 = vmul.f32 -1.442695, %v715_v34  ;;  %v838_v41 = vadd.f32 %v1831_v25, %v837_v35  ;;  %v1753_v35 = vld [vmem:[%s2315_s7 + $0x38] sm:$0xff] }
 0x17a   : > { %v1835_v42 = vpop.eup %1834  ;;  %v756_v43 = vadd.f32 1.0, %v1833_v38  ;;  %1279 = vmatpush.bf16.msra.mxu3 %v1753_v35  ;;  %v1750_v38 = vld [vmem:[%s2315_s7 + $0x20] sm:$0xff] }
 0x17b   : > { %1836 = vpow2.f32 %v1640_v39  ;;  %v842_v46 = vsel %vm841_vm15, %v1831_v25, %v838_v41  ;;  %v850_v47 = vmul.f32 %v1835_v42, %v2155_v26  ;;  %vm855_vm1 = vweird.f32 %v1835_v42  ;;  %v1749_v39 = vld [vmem:[%s2315_s7 + $0x18] sm:$0xff]  ;;  %v1748_v41 = vld [vmem:[%s2315_s7 + $0x10] sm:$0xff] }
 0x17c   : > { %1838 = vrcp.f32 %v756_v43  ;;  %v847_v49 = vsel %vm844_vm0, %v846_v45, %v842_v46  ;;  %v875_v0 = vand.u32 2147483648, %v756_v43  ;;  %v873_v2 = vand.u32 2147483647, %v756_v43  ;;  %vm2173_vm4 = vmor %vm854_vm2, %vm855_vm1  ;;  %v1746_v46 = vld [vmem:[%s2315_s7] sm:$0xff] }
 0x17d   : > { %v911_v50 = vpack.c.bf16 %v847_v49, %v832_v48  ;;  %v851_v51 = vsub.f32 1.0, %v850_v47  ;;  %vm869_vm5 = vweird.f32 %v756_v43 }
 0x17e   : > { %v716_v52 = vpop.f32.mrf.mxu1  ;;  %v876_v10 = vor.u32 1.1754944e-38, %v875_v0  ;;  %vm874_vm8 = vcmp.eq.f32.partialorder %v873_v2, 8.507059e+37  ;;  %1280 = vmatpush.bf16.msra.mxu3 %v1752_v36 }
 0x17f   : > { %v717_v53 = vadd.f32 %v2113_v63, %v716_v52  ;;  %1000 = vmatmul.bf16.gmra.mxu2 %v911_v50  ;;  %v852_v56 = vmul.f32 %v1835_v42, %v851_v51 }
 0x181   : > { %v1837_v54 = vpop.eup %1836  ;;  %v1641_v55 = vmul.f32 -1.442695, %v717_v53  ;;  %v853_v60 = vadd.f32 %v1835_v42, %v852_v56 }
 0x182   : > { %v1839_v57 = vpop.eup %1838  ;;  %v757_v58 = vadd.f32 1.0, %v1837_v54  ;;  %1281 = vmatpush.bf16.msra.mxu3 %v1751_v37 }
 0x183   : > { %1840 = vpow2.f32 %v1641_v55  ;;  %v865_v59 = vmul.f32 %v1839_v57, %v756_v43  ;;  %vm870_vm3 = vweird.f32 %v1839_v57  ;;  %v857_v5 = vsel %vm2173_vm4, %v1835_v42, %v853_v60 }
 0x184   : > { %1842 = vrcp.f32 %v757_v58  ;;  %vm871_vm6 = vmor %vm869_vm5, %vm870_vm3  ;;  %v862_v13 = vsel %vm859_vm7, %v861_v9, %v857_v5  ;;  %vm884_vm10 = vweird.f32 %v757_v58  ;;  %v890_v22 = vand.u32 2147483648, %v757_v58 }
 0x185   : > { %v866_v61 = vsub.f32 1.0, %v865_v59  ;;  %v888_v23 = vand.u32 2147483647, %v757_v58 }
 0x186   : > { %v891_v29 = vor.u32 1.1754944e-38, %v890_v22  ;;  %1282 = vmatpush.bf16.msra.mxu3 %v1750_v38 }
 0x187   : > { %v867_v63 = vmul.f32 %v1839_v57, %v866_v61  ;;  %vm889_vm15 = vcmp.eq.f32.partialorder %v888_v23, 8.507059e+37 }
 0x189   : > { %v1841_v4 = vpop.eup %1840  ;;  %v868_v6 = vadd.f32 %v1839_v57, %v867_v63 }
 0x18a   : > { %v1843_v7 = vpop.eup %1842  ;;  %v758_v8 = vadd.f32 1.0, %v1841_v4  ;;  %1283 = vmatpush.bf16.msra.mxu3 %v1749_v39 }
 0x18b   : > { %v872_v11 = vsel %vm871_vm6, %v1839_v57, %v868_v6  ;;  %v880_v12 = vmul.f32 %v1843_v7, %v757_v58  ;;  %vm885_vm9 = vweird.f32 %v1843_v7 }
 0x18c   : > { %1844 = vrcp.f32 %v758_v8  ;;  %v877_v14 = vsel %vm874_vm8, %v876_v10, %v872_v11  ;;  %v905_v24 = vand.u32 2147483648, %v758_v8  ;;  %v903_v26 = vand.u32 2147483647, %v758_v8  ;;  %vm886_vm12 = vmor %vm884_vm10, %vm885_vm9 }
 0x18d   : > { %v912_v15 = vpack.c.bf16 %v877_v14, %v862_v13  ;;  %v881_v16 = vsub.f32 1.0, %v880_v12  ;;  %vm899_vm13 = vweird.f32 %v758_v8 }
 0x18e   : > { %v906_v30 = vor.u32 1.1754944e-38, %v905_v24  ;;  %vm904_vm0 = vcmp.eq.f32.partialorder %v903_v26, 8.507059e+37  ;;  %1284 = vmatpush.bf16.msra.mxu3 %v1748_v41 }
 0x18f   : > { %1005 = vmatmul.bf16.gmra.mxu2 %v912_v15  ;;  %v882_v17 = vmul.f32 %v1843_v7, %v881_v16 }
 0x191   : > { %v883_v20 = vadd.f32 %v1843_v7, %v882_v17 }
 0x192   : > { %v1845_v18 = vpop.eup %1844  ;;  %1285 = vmatpush.bf16.msra.mxu3 %v1747_v44 }
 0x193   : > { %v895_v19 = vmul.f32 %v1845_v18, %v758_v8  ;;  %vm900_vm11 = vweird.f32 %v1845_v18  ;;  %v887_v27 = vsel %vm886_vm12, %v1843_v7, %v883_v20 }
 0x194   : > { %vm901_vm14 = vmor %vm899_vm13, %vm900_vm11  ;;  %v892_v32 = vsel %vm889_vm15, %v891_v29, %v887_v27 }
 0x195   : > { %v896_v21 = vsub.f32 1.0, %v895_v19 }
 0x196   : > { %1286 = vmatpush.bf16.msra.mxu3 %v1746_v46 }
 0x197   : > { %v897_v25 = vmul.f32 %v1845_v18, %v896_v21 }
 0x199   : > { %v898_v28 = vadd.f32 %v1845_v18, %v897_v25 }
 0x19b   : > { %v902_v31 = vsel %vm901_vm14, %v1845_v18, %v898_v28 }
 0x19c   : > { %v907_v33 = vsel %vm904_vm0, %v906_v30, %v902_v31 }
 0x19d   : > { %v913_v34 = vpack.c.bf16 %v907_v33, %v892_v32 }
 0x19f   : > { %1010 = vmatmul.bf16.gmra.mxu2 %v913_v34 }
 0x1e2   : > { %v991_v42 = vpop.f32.mrf.mxu2 }
 0x1e3   : > { %v992_v43 = vadd.f32 %v2197_v40, %v991_v42 }
 0x1e5   : > { %v1674_v45 = vmul.f32 -1.442695, %v992_v43 }
 0x1e7   : > { %1846 = vpow2.f32 %v1674_v45 }
 0x1ea   : > { %v993_v47 = vpop.f32.mrf.mxu2 }
 0x1eb   : > { %v994_v48 = vadd.f32 %v2197_v40, %v993_v47 }
 0x1ed   : > { %v1847_v49 = vpop.eup %1846  ;;  %v1675_v50 = vmul.f32 -1.442695, %v994_v48 }
 0x1ee   : > { %v1046_v51 = vadd.f32 1.0, %v1847_v49 }
 0x1ef   : > { %1848 = vpow2.f32 %v1675_v50 }
 0x1f0   : > { %1850 = vrcp.f32 %v1046_v51  ;;  %vm1061_vm2 = vweird.f32 %v1046_v51  ;;  %v1065_v7 = vand.u32 2147483647, %v1046_v51  ;;  %v1067_v8 = vand.u32 2147483648, %v1046_v51 }
 0x1f2   : > { %v996_v52 = vpop.f32.mrf.mxu2  ;;  %vm1066_vm6 = vcmp.eq.f32.partialorder %v1065_v7, 8.507059e+37  ;;  %v1068_v20 = vor.u32 1.1754944e-38, %v1067_v8 }
 0x1f3   : > { %v997_v53 = vadd.f32 %v2197_v40, %v996_v52 }
 0x1f5   : > { %v1849_v54 = vpop.eup %1848  ;;  %v1676_v55 = vmul.f32 -1.442695, %v997_v53 }
 0x1f6   : > { %v1851_v56 = vpop.eup %1850  ;;  %v1047_v57 = vadd.f32 1.0, %v1849_v54 }
 0x1f7   : > { %1852 = vpow2.f32 %v1676_v55  ;;  %v1057_v58 = vmul.f32 %v1851_v56, %v1046_v51  ;;  %vm1062_vm1 = vweird.f32 %v1851_v56 }
 0x1f8   : > { %1854 = vrcp.f32 %v1047_v57  ;;  %v1082_v9 = vand.u32 2147483648, %v1047_v57  ;;  %v1080_v12 = vand.u32 2147483647, %v1047_v57  ;;  %vm2216_vm4 = vmor %vm1061_vm2, %vm1062_vm1  ;;  %vm1076_vm5 = vweird.f32 %v1047_v57 }
 0x1f9   : > { %v1058_v59 = vsub.f32 1.0, %v1057_v58 }
 0x1fa   : > { %v998_v60 = vpop.f32.mrf.mxu2  ;;  %v1083_v21 = vor.u32 1.1754944e-38, %v1082_v9  ;;  %vm1081_vm8 = vcmp.eq.f32.partialorder %v1080_v12, 8.507059e+37 }
 0x1fb   : > { %v999_v61 = vadd.f32 %v2197_v40, %v998_v60  ;;  %v1059_v1 = vmul.f32 %v1851_v56, %v1058_v59 }
 0x1fd   : > { %v1853_v62 = vpop.eup %1852  ;;  %v1677_v0 = vmul.f32 -1.442695, %v999_v61  ;;  %v1060_v4 = vadd.f32 %v1851_v56, %v1059_v1 }
 0x1fe   : > { %v1855_v63 = vpop.eup %1854  ;;  %v2212_v2 = vadd.f32 1.0, %v1853_v62 }
 0x1ff   : > { %1856 = vpow2.f32 %v1677_v0  ;;  %v1072_v3 = vmul.f32 %v1855_v63, %v1047_v57  ;;  %vm1077_vm3 = vweird.f32 %v1855_v63  ;;  %v1064_v16 = vsel %vm2216_vm4, %v1851_v56, %v1060_v4 }
 0x200   : > { %1858 = vrcp.f32 %v2212_v2  ;;  %vm1078_vm7 = vmor %vm1076_vm5, %vm1077_vm3  ;;  %v1069_v23 = vsel %vm1066_vm6, %v1068_v20, %v1064_v16  ;;  %vm1091_vm10 = vweird.f32 %v2212_v2  ;;  %v1095_v39 = vand.u32 2147483647, %v2212_v2 }
 0x201   : > { %v1073_v5 = vsub.f32 1.0, %v1072_v3  ;;  %v1097_v41 = vand.u32 2147483648, %v2212_v2 }
 0x202   : > { %v1001_v6 = vpop.f32.mrf.mxu2  ;;  %vm1096_vm14 = vcmp.eq.f32.partialorder %v1095_v39, 8.507059e+37 }
 0x203   : > { %v1002_v10 = vadd.f32 %v2197_v40, %v1001_v6  ;;  %v1074_v11 = vmul.f32 %v1855_v63, %v1073_v5  ;;  %v1098_v53 = vor.u32 1.1754944e-38, %v1097_v41 }
 0x205   : > { %v1857_v14 = vpop.eup %1856  ;;  %v1678_v15 = vmul.f32 -1.442695, %v1002_v10  ;;  %v1075_v17 = vadd.f32 %v1855_v63, %v1074_v11 }
 0x206   : > { %v1859_v18 = vpop.eup %1858  ;;  %v1049_v19 = vadd.f32 1.0, %v1857_v14 }
 0x207   : > { %1860 = vpow2.f32 %v1678_v15  ;;  %v1079_v22 = vsel %vm1078_vm7, %v1855_v63, %v1075_v17  ;;  %v1087_v24 = vmul.f32 %v1859_v18, %v2212_v2  ;;  %vm1092_vm9 = vweird.f32 %v1859_v18 }
 0x208   : > { %1862 = vrcp.f32 %v1049_v19  ;;  %v1084_v25 = vsel %vm1081_vm8, %v1083_v21, %v1079_v22  ;;  %v1112_v42 = vand.u32 2147483648, %v1049_v19  ;;  %v1110_v45 = vand.u32 2147483647, %v1049_v19  ;;  %vm2231_vm12 = vmor %vm1091_vm10, %vm1092_vm9 }
 0x209   : > { %v1206_v26 = vpack.c.bf16 %v1084_v25, %v1069_v23  ;;  %v1088_v27 = vsub.f32 1.0, %v1087_v24  ;;  %vm1106_vm13 = vweird.f32 %v1049_v19 }
 0x20a   : > { %v1003_v28 = vpop.f32.mrf.mxu2  ;;  %v1113_v54 = vor.u32 1.1754944e-38, %v1112_v42  ;;  %vm1111_vm0 = vcmp.eq.f32.partialorder %v1110_v45, 8.507059e+37 }
 0x20b   : > { %v1004_v29 = vadd.f32 %v2197_v40, %v1003_v28  ;;  %1287 = vmatmul.bf16.vlgmr.msra.gmra.mxu3 %v1206_v26  ;;  %v1089_v32 = vmul.f32 %v1859_v18, %v1088_v27 }
 0x20d   : > { %v1861_v30 = vpop.eup %1860  ;;  %v1679_v31 = vmul.f32 -1.442695, %v1004_v29  ;;  %v1090_v36 = vadd.f32 %v1859_v18, %v1089_v32 }
 0x20e   : > { %v1863_v33 = vpop.eup %1862  ;;  %v2224_v34 = vadd.f32 1.0, %v1861_v30 }
 0x20f   : > { %1864 = vpow2.f32 %v1679_v31  ;;  %v1102_v35 = vmul.f32 %v1863_v33, %v1049_v19  ;;  %vm1107_vm11 = vweird.f32 %v1863_v33  ;;  %v1094_v49 = vsel %vm2231_vm12, %v1859_v18, %v1090_v36 }
 0x210   : > { %1866 = vrcp.f32 %v2224_v34  ;;  %vm1108_vm15 = vmor %vm1106_vm13, %vm1107_vm11  ;;  %v1099_v57 = vsel %vm1096_vm14, %v1098_v53, %v1094_v49  ;;  %vm1121_vm2 = vweird.f32 %v2224_v34  ;;  %v1125_v8 = vand.u32 2147483647, %v2224_v34 }
 0x211   : > { %v1103_v37 = vsub.f32 1.0, %v1102_v35  ;;  %v1127_v9 = vand.u32 2147483648, %v2224_v34 }
 0x212   : > { %v1006_v38 = vpop.f32.mrf.mxu2  ;;  %vm1126_vm6 = vcmp.eq.f32.partialorder %v1125_v8, 8.507059e+37 }
 0x213   : > { %v1007_v43 = vadd.f32 %v2197_v40, %v1006_v38  ;;  %v1104_v44 = vmul.f32 %v1863_v33, %v1103_v37  ;;  %v1128_v21 = vor.u32 1.1754944e-38, %v1127_v9 }
 0x215   : > { %v1865_v47 = vpop.eup %1864  ;;  %v1680_v48 = vmul.f32 -1.442695, %v1007_v43  ;;  %v1105_v50 = vadd.f32 %v1863_v33, %v1104_v44 }
 0x216   : > { %v1867_v51 = vpop.eup %1866  ;;  %v1051_v52 = vadd.f32 1.0, %v1865_v47 }
 0x217   : > { %1868 = vpow2.f32 %v1680_v48  ;;  %v1109_v55 = vsel %vm1108_vm15, %v1863_v33, %v1105_v50  ;;  %v1117_v56 = vmul.f32 %v1867_v51, %v2224_v34  ;;  %vm1122_vm1 = vweird.f32 %v1867_v51 }
 0x218   : > { %1870 = vrcp.f32 %v1051_v52  ;;  %v1114_v58 = vsel %vm1111_vm0, %v1113_v54, %v1109_v55  ;;  %v1142_v10 = vand.u32 2147483648, %v1051_v52  ;;  %v1140_v13 = vand.u32 2147483647, %v1051_v52  ;;  %vm2246_vm4 = vmor %vm1121_vm2, %vm1122_vm1 }
 0x219   : > { %v1207_v59 = vpack.c.bf16 %v1114_v58, %v1099_v57  ;;  %v1118_v60 = vsub.f32 1.0, %v1117_v56  ;;  %vm1136_vm5 = vweird.f32 %v1051_v52 }
 0x21a   : > { %v1008_v61 = vpop.f32.mrf.mxu2  ;;  %v1143_v22 = vor.u32 1.1754944e-38, %v1142_v10  ;;  %vm1141_vm8 = vcmp.eq.f32.partialorder %v1140_v13, 8.507059e+37 }
 0x21b   : > { %v1009_v62 = vadd.f32 %v2197_v40, %v1008_v61  ;;  %1292 = vmatmul.bf16.gmra.mxu3 %v1207_v59  ;;  %v1119_v63 = vmul.f32 %v1867_v51, %v1118_v60 }
 0x21d   : > { %v1869_v0 = vpop.eup %1868  ;;  %v1681_v1 = vmul.f32 -1.442695, %v1009_v62  ;;  %v1120_v5 = vadd.f32 %v1867_v51, %v1119_v63 }
 0x21e   : > { %v1871_v2 = vpop.eup %1870  ;;  %v2239_v3 = vadd.f32 1.0, %v1869_v0 }
 0x21f   : > { %1872 = vpow2.f32 %v1681_v1  ;;  %v1132_v4 = vmul.f32 %v1871_v2, %v1051_v52  ;;  %vm1137_vm3 = vweird.f32 %v1871_v2  ;;  %v1124_v17 = vsel %vm2246_vm4, %v1867_v51, %v1120_v5 }
 0x220   : > { %1874 = vrcp.f32 %v2239_v3  ;;  %vm1138_vm7 = vmor %vm1136_vm5, %vm1137_vm3  ;;  %v1129_v25 = vsel %vm1126_vm6, %v1128_v21, %v1124_v17  ;;  %vm1151_vm10 = vweird.f32 %v2239_v3  ;;  %v1157_v39 = vand.u32 2147483648, %v2239_v3 }
 0x221   : > { %v1133_v6 = vsub.f32 1.0, %v1132_v4  ;;  %v1155_v42 = vand.u32 2147483647, %v2239_v3 }
 0x222   : > { %v1011_v7 = vpop.f32.mrf.mxu2  ;;  %v1158_v50 = vor.u32 1.1754944e-38, %v1157_v39 }
 0x223   : > { %v1012_v11 = vadd.f32 %v2197_v40, %v1011_v7  ;;  %v1134_v12 = vmul.f32 %v1871_v2, %v1133_v6  ;;  %vm1156_vm15 = vcmp.eq.f32.partialorder %v1155_v42, 8.507059e+37 }
 0x225   : > { %v1873_v15 = vpop.eup %1872  ;;  %v1682_v16 = vmul.f32 -1.442695, %v1012_v11  ;;  %v1135_v18 = vadd.f32 %v1871_v2, %v1134_v12  ;;  %v2266_v12 = vld [vmem:[%s2316_s8] ss:$0 sm:$0xff] }
 0x226   : > { %v1875_v19 = vpop.eup %1874  ;;  %v1053_v20 = vadd.f32 1.0, %v1873_v15 }
 0x227   : > { %1876 = vpow2.f32 %v1682_v16  ;;  %v1139_v24 = vsel %vm1138_vm7, %v1871_v2, %v1135_v18  ;;  %v1147_v23 = vmul.f32 %v1875_v19, %v2239_v3  ;;  %vm1152_vm9 = vweird.f32 %v1875_v19 }
 0x228   : > { %1878 = vrcp.f32 %v1053_v20  ;;  %v1144_v26 = vsel %vm1141_vm8, %v1143_v22, %v1139_v24  ;;  %v1172_v41 = vand.u32 2147483648, %v1053_v20  ;;  %v1170_v43 = vand.u32 2147483647, %v1053_v20  ;;  %vm2257_vm12 = vmor %vm1151_vm10, %vm1152_vm9 }
 0x229   : > { %v1208_v27 = vpack.c.bf16 %v1144_v26, %v1129_v25  ;;  %v1148_v28 = vsub.f32 1.0, %v1147_v23  ;;  %vm1166_vm13 = vweird.f32 %v1053_v20 }
 0x22a   : > { %v1013_v29 = vpop.f32.mrf.mxu2  ;;  %v1173_v51 = vor.u32 1.1754944e-38, %v1172_v41  ;;  %vm1171_vm0 = vcmp.eq.f32.partialorder %v1170_v43, 8.507059e+37 }
 0x22b   : > { %v1014_v30 = vadd.f32 %v2197_v40, %v1013_v29  ;;  %1297 = vmatmul.bf16.gmra.mxu3 %v1208_v27  ;;  %v1149_v33 = vmul.f32 %v1875_v19, %v1148_v28 }
 0x22d   : > { %v1877_v31 = vpop.eup %1876  ;;  %v1683_v32 = vmul.f32 -1.442695, %v1014_v30  ;;  %v1150_v37 = vadd.f32 %v1875_v19, %v1149_v33 }
 0x22e   : > { %v1879_v34 = vpop.eup %1878  ;;  %v1054_v35 = vadd.f32 1.0, %v1877_v31 }
 0x22f   : > { %1880 = vpow2.f32 %v1683_v32  ;;  %v1162_v36 = vmul.f32 %v1879_v34, %v1053_v20  ;;  %vm1167_vm11 = vweird.f32 %v1879_v34  ;;  %v1154_v46 = vsel %vm2257_vm12, %v1875_v19, %v1150_v37 }
 0x230   : > { %1882 = vrcp.f32 %v1054_v35  ;;  %vm1168_vm14 = vmor %vm1166_vm13, %vm1167_vm11  ;;  %v1159_v54 = vsel %vm1156_vm15, %v1158_v50, %v1154_v46  ;;  %vm1181_vm2 = vweird.f32 %v1054_v35  ;;  %v1187_v0 = vand.u32 2147483648, %v1054_v35 }
 0x231   : > { %v1163_v38 = vsub.f32 1.0, %v1162_v36  ;;  %v1185_v63 = vand.u32 2147483647, %v1054_v35  ;;  %vm1503_vm12 = vcmask 64512  }
 0x232   : > { %v1188_v6 = vor.u32 1.1754944e-38, %v1187_v0 }
 0x233   : > { %v1164_v40 = vmul.f32 %v1879_v34, %v1163_v38  ;;  %vm1186_vm7 = vcmp.eq.f32.partialorder %v1185_v63, 8.507059e+37 }
 0x235   : > { %v1881_v45 = vpop.eup %1880  ;;  %v1165_v47 = vadd.f32 %v1879_v34, %v1164_v40 }
 0x236   : > { %v1883_v48 = vpop.eup %1882  ;;  %v1055_v49 = vadd.f32 1.0, %v1881_v45 }
 0x237   : > { %v1169_v52 = vsel %vm1168_vm14, %v1879_v34, %v1165_v47  ;;  %v1177_v53 = vmul.f32 %v1883_v48, %v1054_v35  ;;  %vm1182_vm1 = vweird.f32 %v1883_v48 }
 0x238   : > { %1884 = vrcp.f32 %v1055_v49  ;;  %v1174_v55 = vsel %vm1171_vm0, %v1173_v51, %v1169_v52  ;;  %v1202_v1 = vand.u32 2147483648, %v1055_v49  ;;  %v1200_v3 = vand.u32 2147483647, %v1055_v49  ;;  %vm1183_vm4 = vmor %vm1181_vm2, %vm1182_vm1 }
 0x239   : > { %v1209_v56 = vpack.c.bf16 %v1174_v55, %v1159_v54  ;;  %v1178_v57 = vsub.f32 1.0, %v1177_v53  ;;  %vm1196_vm5 = vweird.f32 %v1055_v49 }
 0x23a   : > { %v1203_v7 = vor.u32 1.1754944e-38, %v1202_v1  ;;  %vm1201_vm8 = vcmp.eq.f32.partialorder %v1200_v3, 8.507059e+37 }
 0x23b   : > { %1302 = vmatmul.bf16.gmra.mxu3 %v1209_v56  ;;  %v1179_v58 = vmul.f32 %v1883_v48, %v1178_v57 }
 0x23d   : > { %v1180_v61 = vadd.f32 %v1883_v48, %v1179_v58 }
 0x23e   : > { %v1885_v59 = vpop.eup %1884 }
 0x23f   : > { %v1192_v60 = vmul.f32 %v1885_v59, %v1055_v49  ;;  %vm1197_vm3 = vweird.f32 %v1885_v59  ;;  %v1184_v4 = vsel %vm1183_vm4, %v1883_v48, %v1180_v61 }
 0x240   : > { %vm1198_vm6 = vmor %vm1196_vm5, %vm1197_vm3  ;;  %v1189_v9 = vsel %vm1186_vm7, %v1188_v6, %v1184_v4 }
 0x241   : > { %v1193_v62 = vsub.f32 1.0, %v1192_v60 }
 0x243   : > { %v1194_v2 = vmul.f32 %v1885_v59, %v1193_v62 }
 0x245   : > { %v1195_v5 = vadd.f32 %v1885_v59, %v1194_v2 }
 0x247   : > { %v1199_v8 = vsel %vm1198_vm6, %v1885_v59, %v1195_v5 }
 0x248   : > { %v1204_v10 = vsel %vm1201_vm8, %v1203_v7, %v1199_v8 }
 0x249   : > { %v1210_v11 = vpack.c.bf16 %v1204_v10, %v1189_v9 }
 0x24b   : > { %1307 = vmatmul.bf16.gmra.mxu3 %v1210_v11 }
 0x28e   : > { %v1288_v13 = vpop.f32.mrf.mxu3 }
 0x28f   : > { %v1289_v14 = vadd.f32 %v2266_v12, %v1288_v13 }
 0x291   : > { %v1716_v15 = vmul.f32 -1.442695, %v1289_v14 }
 0x293   : > { %1886 = vpow2.f32 %v1716_v15 }
 0x296   : > { %v1290_v16 = vpop.f32.mrf.mxu3 }
 0x297   : > { %v1291_v17 = vadd.f32 %v2266_v12, %v1290_v16 }
 0x299   : > { %v1887_v18 = vpop.eup %1886  ;;  %v1717_v19 = vmul.f32 -1.442695, %v1291_v17 }
 0x29a   : > { %v1343_v20 = vadd.f32 1.0, %v1887_v18 }
 0x29b   : > { %1888 = vpow2.f32 %v1717_v19 }
 0x29c   : > { %1890 = vrcp.f32 %v1343_v20  ;;  %v1364_v29 = vand.u32 2147483648, %v1343_v20  ;;  %v1362_v32 = vand.u32 2147483647, %v1343_v20  ;;  %vm1358_vm10 = vweird.f32 %v1343_v20 }
 0x29e   : > { %v1293_v21 = vpop.f32.mrf.mxu3  ;;  %v1365_v38 = vor.u32 1.1754944e-38, %v1364_v29  ;;  %vm1363_vm13 = vcmp.eq.f32.partialorder %v1362_v32, 8.507059e+37 }
 0x29f   : > { %v1294_v22 = vadd.f32 %v2266_v12, %v1293_v21 }
 0x2a1   : > { %v1889_v24 = vpop.eup %1888  ;;  %v1718_v23 = vmul.f32 -1.442695, %v1294_v22 }
 0x2a2   : > { %v1891_v25 = vpop.eup %1890  ;;  %v1344_v26 = vadd.f32 1.0, %v1889_v24 }
 0x2a3   : > { %v1354_v27 = vmul.f32 %v1891_v25, %v1343_v20  ;;  %1892 = vpow2.f32 %v1718_v23  ;;  %vm1359_vm9 = vweird.f32 %v1891_v25 }
 0x2a4   : > { %1894 = vrcp.f32 %v1344_v26  ;;  %vm1360_vm11 = vmor %vm1358_vm10, %vm1359_vm9  ;;  %v1379_v44 = vand.u32 2147483648, %v1344_v26  ;;  %v1377_v47 = vand.u32 2147483647, %v1344_v26  ;;  %vm1373_vm15 = vweird.f32 %v1344_v26 }
 0x2a5   : > { %v1355_v28 = vsub.f32 1.0, %v1354_v27 }
 0x2a6   : > { %v1295_v30 = vpop.f32.mrf.mxu3  ;;  %v1380_v53 = vor.u32 1.1754944e-38, %v1379_v44  ;;  %vm1378_vm1 = vcmp.eq.f32.partialorder %v1377_v47, 8.507059e+37 }
 0x2a7   : > { %v1356_v31 = vmul.f32 %v1891_v25, %v1355_v28  ;;  %v1296_v33 = vadd.f32 %v2266_v12, %v1295_v30 }
 0x2a9   : > { %v1893_v34 = vpop.eup %1892  ;;  %v1357_v35 = vadd.f32 %v1891_v25, %v1356_v31  ;;  %v1719_v36 = vmul.f32 -1.442695, %v1296_v33 }
 0x2aa   : > { %v1895_v37 = vpop.eup %1894  ;;  %v1345_v39 = vadd.f32 1.0, %v1893_v34 }
 0x2ab   : > { %v1361_v41 = vsel %vm1360_vm11, %v1891_v25, %v1357_v35  ;;  %v1369_v42 = vmul.f32 %v1895_v37, %v1344_v26  ;;  %1896 = vpow2.f32 %v1719_v36  ;;  %vm1374_vm14 = vweird.f32 %v1895_v37 }
 0x2ac   : > { %v1366_v40 = vsel %vm1363_vm13, %v1365_v38, %v1361_v41  ;;  %1898 = vrcp.f32 %v1345_v39  ;;  %vm1375_vm0 = vmor %vm1373_vm15, %vm1374_vm14  ;;  %v1394_v59 = vand.u32 2147483648, %v1345_v39  ;;  %v1392_v62 = vand.u32 2147483647, %v1345_v39 }
 0x2ad   : > { %1504 = vst.msk [vmem:[%s2277_s24] sm:$0xff] %vm1503_vm12, %v1366_v40  ;;  %v1370_v43 = vsub.f32 1.0, %v1369_v42  ;;  %vm1388_vm3 = vweird.f32 %v1345_v39 }
 0x2ae   : > { %v1298_v45 = vpop.f32.mrf.mxu3  ;;  %v1395_v4 = vor.u32 1.1754944e-38, %v1394_v59  ;;  %vm1393_vm5 = vcmp.eq.f32.partialorder %v1392_v62, 8.507059e+37 }
 0x2af   : > { %v1371_v46 = vmul.f32 %v1895_v37, %v1370_v43  ;;  %v1299_v48 = vadd.f32 %v2266_v12, %v1298_v45 }
 0x2b1   : > { %v1897_v49 = vpop.eup %1896  ;;  %v1372_v50 = vadd.f32 %v1895_v37, %v1371_v46  ;;  %v1720_v51 = vmul.f32 -1.442695, %v1299_v48 }
 0x2b2   : > { %v1899_v52 = vpop.eup %1898  ;;  %v1346_v54 = vadd.f32 1.0, %v1897_v49 }
 0x2b3   : > { %v1376_v55 = vsel %vm1375_vm0, %v1895_v37, %v1372_v50  ;;  %v1384_v56 = vmul.f32 %v1899_v52, %v1345_v39  ;;  %1900 = vpow2.f32 %v1720_v51  ;;  %vm1389_vm2 = vweird.f32 %v1899_v52 }
 0x2b4   : > { %v1381_v57 = vsel %vm1378_vm1, %v1380_v53, %v1376_v55  ;;  %1902 = vrcp.f32 %v1346_v54  ;;  %vm1390_vm4 = vmor %vm1388_vm3, %vm1389_vm2  ;;  %v1409_v10 = vand.u32 2147483648, %v1346_v54  ;;  %v1407_v14 = vand.u32 2147483647, %v1346_v54 }
 0x2b5   : > { %1505 = vst.msk [vmem:[%s2277_s24 + $0x8] sm:$0xff] %vm1503_vm12, %v1381_v57  ;;  %v1385_v58 = vsub.f32 1.0, %v1384_v56  ;;  %vm1403_vm7 = vweird.f32 %v1346_v54 }
 0x2b6   : > { %v1300_v60 = vpop.f32.mrf.mxu3  ;;  %v1410_v20 = vor.u32 1.1754944e-38, %v1409_v10  ;;  %vm1408_vm9 = vcmp.eq.f32.partialorder %v1407_v14, 8.507059e+37 }
 0x2b7   : > { %v1386_v61 = vmul.f32 %v1899_v52, %v1385_v58  ;;  %v1301_v0 = vadd.f32 %v2266_v12, %v1300_v60 }
 0x2b9   : > { %v1901_v1 = vpop.eup %1900  ;;  %v1387_v63 = vadd.f32 %v1899_v52, %v1386_v61  ;;  %v1721_v2 = vmul.f32 -1.442695, %v1301_v0 }
 0x2ba   : > { %v1903_v3 = vpop.eup %1902  ;;  %v1347_v5 = vadd.f32 1.0, %v1901_v1 }
 0x2bb   : > { %v1391_v6 = vsel %vm1390_vm4, %v1899_v52, %v1387_v63  ;;  %v1399_v7 = vmul.f32 %v1903_v3, %v1346_v54  ;;  %1904 = vpow2.f32 %v1721_v2  ;;  %vm1404_vm6 = vweird.f32 %v1903_v3 }
 0x2bc   : > { %v1396_v8 = vsel %vm1393_vm5, %v1395_v4, %v1391_v6  ;;  %1906 = vrcp.f32 %v1347_v5  ;;  %vm1405_vm8 = vmor %vm1403_vm7, %vm1404_vm6  ;;  %v1424_v26 = vand.u32 2147483648, %v1347_v5  ;;  %v1422_v29 = vand.u32 2147483647, %v1347_v5 }
 0x2bd   : > { %1506 = vst.msk [vmem:[%s2277_s24 + $0x10] sm:$0xff] %vm1503_vm12, %v1396_v8  ;;  %v1400_v9 = vsub.f32 1.0, %v1399_v7  ;;  %vm1418_vm11 = vweird.f32 %v1347_v5 }
 0x2be   : > { %v1303_v11 = vpop.f32.mrf.mxu3  ;;  %v1425_v35 = vor.u32 1.1754944e-38, %v1424_v26  ;;  %vm1423_vm14 = vcmp.eq.f32.partialorder %v1422_v29, 8.507059e+37 }
 0x2bf   : > { %v1401_v13 = vmul.f32 %v1903_v3, %v1400_v9  ;;  %v1304_v15 = vadd.f32 %v2266_v12, %v1303_v11 }
 0x2c1   : > { %v1905_v16 = vpop.eup %1904  ;;  %v1402_v17 = vadd.f32 %v1903_v3, %v1401_v13  ;;  %v1722_v18 = vmul.f32 -1.442695, %v1304_v15 }
 0x2c2   : > { %v1907_v19 = vpop.eup %1906  ;;  %v1348_v21 = vadd.f32 1.0, %v1905_v16 }
 0x2c3   : > { %v1406_v22 = vsel %vm1405_vm8, %v1903_v3, %v1402_v17  ;;  %v1414_v24 = vmul.f32 %v1907_v19, %v1347_v5  ;;  %1908 = vpow2.f32 %v1722_v18  ;;  %vm1419_vm10 = vweird.f32 %v1907_v19 }
 0x2c4   : > { %v1411_v23 = vsel %vm1408_vm9, %v1410_v20, %v1406_v22  ;;  %1910 = vrcp.f32 %v1348_v21  ;;  %vm1420_vm13 = vmor %vm1418_vm11, %vm1419_vm10  ;;  %v1439_v42 = vand.u32 2147483648, %v1348_v21  ;;  %v1437_v44 = vand.u32 2147483647, %v1348_v21 }
 0x2c5   : > { %1507 = vst.msk [vmem:[%s2277_s24 + $0x18] sm:$0xff] %vm1503_vm12, %v1411_v23  ;;  %v1415_v25 = vsub.f32 1.0, %v1414_v24  ;;  %vm1433_vm0 = vweird.f32 %v1348_v21 }
 0x2c6   : > { %v1305_v27 = vpop.f32.mrf.mxu3  ;;  %v1440_v50 = vor.u32 1.1754944e-38, %v1439_v42  ;;  %vm1438_vm2 = vcmp.eq.f32.partialorder %v1437_v44, 8.507059e+37 }
 0x2c7   : > { %v1416_v28 = vmul.f32 %v1907_v19, %v1415_v25  ;;  %v1306_v30 = vadd.f32 %v2266_v12, %v1305_v27 }
 0x2c9   : > { %v1909_v31 = vpop.eup %1908  ;;  %v1417_v32 = vadd.f32 %v1907_v19, %v1416_v28  ;;  %v1723_v33 = vmul.f32 -1.442695, %v1306_v30 }
 0x2ca   : > { %v1911_v34 = vpop.eup %1910  ;;  %v1349_v36 = vadd.f32 1.0, %v1909_v31 }
 0x2cb   : > { %v1421_v37 = vsel %vm1420_vm13, %v1907_v19, %v1417_v32  ;;  %v1429_v38 = vmul.f32 %v1911_v34, %v1348_v21  ;;  %1912 = vpow2.f32 %v1723_v33  ;;  %vm1434_vm15 = vweird.f32 %v1911_v34 }
 0x2cc   : > { %v1426_v39 = vsel %vm1423_vm14, %v1425_v35, %v1421_v37  ;;  %1914 = vrcp.f32 %v1349_v36  ;;  %vm1435_vm1 = vmor %vm1433_vm0, %vm1434_vm15  ;;  %v1454_v56 = vand.u32 2147483648, %v1349_v36  ;;  %v1452_v59 = vand.u32 2147483647, %v1349_v36 }
 0x2cd   : > { %1508 = vst.msk [vmem:[%s2277_s24 + $0x20] sm:$0xff] %vm1503_vm12, %v1426_v39  ;;  %v1430_v41 = vsub.f32 1.0, %v1429_v38  ;;  %vm1448_vm4 = vweird.f32 %v1349_v36 }
 0x2ce   : > { %v1308_v40 = vpop.f32.mrf.mxu3  ;;  %v1455_v63 = vor.u32 1.1754944e-38, %v1454_v56  ;;  %vm1453_vm6 = vcmp.eq.f32.partialorder %v1452_v59, 8.507059e+37 }
 0x2cf   : > { %v1431_v43 = vmul.f32 %v1911_v34, %v1430_v41  ;;  %v1309_v45 = vadd.f32 %v2266_v12, %v1308_v40 }
 0x2d1   : > { %v1913_v46 = vpop.eup %1912  ;;  %v1432_v47 = vadd.f32 %v1911_v34, %v1431_v43  ;;  %v1724_v48 = vmul.f32 -1.442695, %v1309_v45 }
 0x2d2   : > { %v1915_v49 = vpop.eup %1914  ;;  %v1350_v51 = vadd.f32 1.0, %v1913_v46 }
 0x2d3   : > { %v1436_v52 = vsel %vm1435_vm1, %v1911_v34, %v1432_v47  ;;  %v1444_v53 = vmul.f32 %v1915_v49, %v1349_v36  ;;  %1916 = vpow2.f32 %v1724_v48  ;;  %vm1449_vm3 = vweird.f32 %v1915_v49 }
 0x2d4   : > { %v1441_v54 = vsel %vm1438_vm2, %v1440_v50, %v1436_v52  ;;  %1918 = vrcp.f32 %v1350_v51  ;;  %vm1450_vm5 = vmor %vm1448_vm4, %vm1449_vm3  ;;  %v1469_v7 = vand.u32 2147483648, %v1350_v51  ;;  %v1467_v8 = vand.u32 2147483647, %v1350_v51 }
 0x2d5   : > { %1509 = vst.msk [vmem:[%s2277_s24 + $0x28] sm:$0xff] %vm1503_vm12, %v1441_v54  ;;  %v1445_v55 = vsub.f32 1.0, %v1444_v53  ;;  %vm1463_vm8 = vweird.f32 %v1350_v51 }
 0x2d6   : > { %v1310_v57 = vpop.f32.mrf.mxu3  ;;  %v1470_v13 = vor.u32 1.1754944e-38, %v1469_v7  ;;  %vm1468_vm10 = vcmp.eq.f32.partialorder %v1467_v8, 8.507059e+37 }
 0x2d7   : > { %v1446_v58 = vmul.f32 %v1915_v49, %v1445_v55  ;;  %v1311_v60 = vadd.f32 %v2266_v12, %v1310_v57 }
 0x2d9   : > { %v1917_v61 = vpop.eup %1916  ;;  %v1447_v62 = vadd.f32 %v1915_v49, %v1446_v58  ;;  %v1725_v0 = vmul.f32 -1.442695, %v1311_v60 }
 0x2da   : > { %v1919_v1 = vpop.eup %1918  ;;  %v1351_v2 = vadd.f32 1.0, %v1917_v61 }
 0x2db   : > { %v1451_v3 = vsel %vm1450_vm5, %v1915_v49, %v1447_v62  ;;  %v1459_v4 = vmul.f32 %v1919_v1, %v1350_v51  ;;  %1920 = vpow2.f32 %v1725_v0  ;;  %vm1464_vm7 = vweird.f32 %v1919_v1 }
 0x2dc   : > { %v1456_v5 = vsel %vm1453_vm6, %v1455_v63, %v1451_v3  ;;  %1922 = vrcp.f32 %v1351_v2  ;;  %vm1465_vm9 = vmor %vm1463_vm8, %vm1464_vm7  ;;  %v1484_v19 = vand.u32 2147483648, %v1351_v2  ;;  %v1482_v21 = vand.u32 2147483647, %v1351_v2 }
 0x2dd   : > { %1510 = vst.msk [vmem:[%s2277_s24 + $0x30] sm:$0xff] %vm1503_vm12, %v1456_v5  ;;  %v1460_v6 = vsub.f32 1.0, %v1459_v4  ;;  %vm1478_vm13 = vweird.f32 %v1351_v2 }
 0x2de   : > { %v1485_v23 = vor.u32 1.1754944e-38, %v1484_v19  ;;  %vm1483_vm15 = vcmp.eq.f32.partialorder %v1482_v21, 8.507059e+37 }
 0x2df   : > { %v1461_v12 = vmul.f32 %v1919_v1, %v1460_v6 }
 0x2e1   : > { %v1921_v9 = vpop.eup %1920  ;;  %v1462_v10 = vadd.f32 %v1919_v1, %v1461_v12 }
 0x2e2   : > { %v1923_v11 = vpop.eup %1922  ;;  %v1352_v14 = vadd.f32 1.0, %v1921_v9 }
 0x2e3   : > { %v1466_v15 = vsel %vm1465_vm9, %v1919_v1, %v1462_v10  ;;  %v1474_v16 = vmul.f32 %v1923_v11, %v1351_v2  ;;  %vm1479_vm11 = vweird.f32 %v1923_v11 }
 0x2e4   : > { %v1471_v17 = vsel %vm1468_vm10, %v1470_v13, %v1466_v15  ;;  %1924 = vrcp.f32 %v1352_v14  ;;  %vm1480_vm14 = vmor %vm1478_vm13, %vm1479_vm11  ;;  %v1499_v29 = vand.u32 2147483648, %v1352_v14  ;;  %v1497_v31 = vand.u32 2147483647, %v1352_v14 }
 0x2e5   : > { %1511 = vst.msk [vmem:[%s2277_s24 + $0x38] sm:$0xff] %vm1503_vm12, %v1471_v17  ;;  %v1475_v18 = vsub.f32 1.0, %v1474_v16  ;;  %vm1493_vm1 = vweird.f32 %v1352_v14 }
 0x2e6   : > { %v1500_v33 = vor.u32 1.1754944e-38, %v1499_v29  ;;  %vm1498_vm3 = vcmp.eq.f32.partialorder %v1497_v31, 8.507059e+37 }
 0x2e7   : > { %v1476_v20 = vmul.f32 %v1923_v11, %v1475_v18 }
 0x2e9   : > { %v1477_v22 = vadd.f32 %v1923_v11, %v1476_v20 }
 0x2ea   : > { %v1925_v24 = vpop.eup %1924 }
 0x2eb   : > { %v1481_v25 = vsel %vm1480_vm14, %v1923_v11, %v1477_v22  ;;  %v1489_v26 = vmul.f32 %v1925_v24, %v1352_v14  ;;  %vm1494_vm0 = vweird.f32 %v1925_v24 }
 0x2ec   : > { %v1486_v27 = vsel %vm1483_vm15, %v1485_v23, %v1481_v25  ;;  %vm1495_vm2 = vmor %vm1493_vm1, %vm1494_vm0 }
 0x2ed   : > { %1512 = vst.msk [vmem:[%s2277_s24 + $0x40] sm:$0xff] %vm1503_vm12, %v1486_v27  ;;  %v1490_v28 = vsub.f32 1.0, %v1489_v26 }
 0x2ef   : > { %v1491_v30 = vmul.f32 %v1925_v24, %v1490_v28 }
 0x2f1   : > { %v1492_v32 = vadd.f32 %v1925_v24, %v1491_v30 }
 0x2f3   : > { %v1496_v34 = vsel %vm1495_vm2, %v1925_v24, %v1492_v32 }
 0x2f4   : > { %v1501_v35 = vsel %vm1498_vm3, %v1500_v33, %v1496_v34 }
 0x2f5   : > { %1513 = vst.msk [vmem:[%s2277_s24 + $0x48] sm:$0xff] %vm1503_vm12, %v1501_v35 }
 0x2f6 PF: > { %s19_s30 = sadd.s32 1, %s1932_s30  }
 0x2f7   : > { %p16_p4 = scmp.ge.s32.totalorder %s19_s30, 6  }
 0x2f9   :  { %18 = sbr.rel (!%p16_p4) target bundleno = 1 (0x1), region = 86 }

</bundles_post_ra>
